<compile_context>
chip_gen: v5e
topology: v5e:2x2
jax: 0.10.0
libtpu: 0.0.40
codegen_flags: <defaults>
</compile_context>

<pallas_src>
import functools

import jax
import jax.numpy as jnp
from jax.experimental import pallas as pl
from jax.experimental.pallas import tpu as pltpu

LN_EPS = 1e-12   # matches LayerNormalization(d_model, eps=1e-12)
NEG_INF = -1e9


# ---------------------------------------------------------------------------
# in-kernel helpers
# ---------------------------------------------------------------------------
def _layer_norm(x, gamma, beta):
    mean = jnp.mean(x, axis=-1, keepdims=True)
    xc = x - mean
    var = jnp.mean(xc * xc, axis=-1, keepdims=True)   # biased variance
    return xc * jax.lax.rsqrt(var + LN_EPS) * gamma + beta


def _ffn(x, wff1_ref, bff1_ref, wff2_ref, bff2_ref, ff_chunk):
    """Position-wise FFN, chunked over d_ff (no full (N, d_ff) f32 temp)."""
    N, _ = x.shape
    d_ff = wff1_ref.shape[1]
    D_out = wff2_ref.shape[1]
    x16 = x.astype(jnp.bfloat16)
    step = min(ff_chunk, d_ff)
    acc = jnp.zeros((N, D_out), jnp.float32)
    for c0 in range(0, d_ff, step):            # static, lane-aligned slices
        c1 = min(c0 + step, d_ff)
        h = jnp.dot(x16, wff1_ref[:, c0:c1],
                    preferred_element_type=jnp.float32) + bff1_ref[:, c0:c1]
        h = jnp.maximum(h, 0.0).astype(jnp.bfloat16)
        acc = acc + jnp.dot(h, wff2_ref[c0:c1, :],
                            preferred_element_type=jnp.float32)
    return acc + bff2_ref[...]


# ---------------------------------------------------------------------------
# fused decoder-layer kernel (block_b batch elements per grid step)
# ---------------------------------------------------------------------------
def decoder_layer_kernel(
    # data refs
    x_ref, ek_ref, ev_ref, smask_ref, tmask_ref,
    # self-attention params (fused QKV)
    wqkv1, bqkv1, wo1, bo1,
    # cross-attention params
    wq2, bq2, wk2, bk2, wv2, bv2, wo2, bo2,
    # layer norm params
    g1, be1, g2, be2, g3, be3,
    # FFN params
    wff1, bff1, wff2, bff2,
    # output
    out_ref,
    # scratch: (block_b*S, D) bf16 per-head context assembly buffer
    ctx_scratch,
    *, n_head, block_b, ff_chunk, causal_trg):
    Bb, S, D = x_ref.shape
    S_enc = ek_ref.shape[1]
    dh = D // n_head
    scale = dh ** -0.5

    # Flatten the batch block -> M = block_b*S rows presented to the MXU.
    x = x_ref[...].reshape(Bb * S, D).astype(jnp.float32)
    ek = ek_ref[...].reshape(Bb * S_enc, D).astype(jnp.float32)
    ev = ev_ref[...].reshape(Bb * S_enc, D).astype(jnp.float32)

    # ---- additive attention biases, hoisted out of the head loops --------
    if causal_trg:
        rows = jax.lax.broadcasted_iota(jnp.int32, (S, S), 0)
        cols = jax.lax.broadcasted_iota(jnp.int32, (S, S), 1)
        causal_bias = jnp.where(rows >= cols, 0.0, NEG_INF).astype(jnp.float32)

        def trg_bias(b):                       # same for every batch element
            return causal_bias
    else:
        def trg_bias(b):                       # (Sq or 1, S) broadcasts vs s
            return jnp.where(tmask_ref[b].astype(jnp.float32) > 0.0,
                             0.0, NEG_INF)

    def src_bias(b):                           # (Sq or 1, S_enc)
        return jnp.where(smask_ref[b].astype(jnp.float32) > 0.0,
                         0.0, NEG_INF)

    def attention(q, k, v, wo_ref, bo_ref, bias_fn):
        """q: (Bb*S, D) f32 (bias included); k, v: (Bb*Sk, D) f32."""
        Sk = k.shape[0] // Bb
        q16 = (q * scale).astype(jnp.bfloat16)   # fold 1/sqrt(dh) into q once
        k16 = k.astype(jnp.bfloat16)
        v16 = v.astype(jnp.bfloat16)
        # Static unroll over batch/heads: fine for moderate n_head; for many
        # heads a lax.fori_loop with pl.ds slices would bound vreg pressure.
        for b in range(Bb):
            bias = bias_fn(b)
            qb = q16[b * S:(b + 1) * S]          # cheap sublane slices
            kb = k16[b * Sk:(b + 1) * Sk]
            vb = v16[b * Sk:(b + 1) * Sk]
            for h in range(n_head):
                qh = qb[:, h * dh:(h + 1) * dh]
                kh = kb[:, h * dh:(h + 1) * dh]
                vh = vb[:, h * dh:(h + 1) * dh]
                # scores: contract last dims directly — no explicit transpose
                s = jax.lax.dot_general(
                    qh, kh, (((1,), (1,)), ((), ())),
                    preferred_element_type=jnp.float32) + bias
                m = jnp.max(s, axis=-1, keepdims=True)
                p = jnp.exp(s - m)               # f32 (portable to v5e)
                denom = jnp.sum(p, axis=-1, keepdims=True)
                ctx = jnp.dot(p.astype(jnp.bfloat16), vh,
                              preferred_element_type=jnp.float32)
                # normalize AFTER the PV matmul: O(Sq*dh) scale, EUP reciprocal
                ctx = ctx * pl.reciprocal(denom, approx=True)
                ctx_scratch[b * S:(b + 1) * S, h * dh:(h + 1) * dh] = (
                    ctx.astype(jnp.bfloat16))
        # one K=D output projection over all rows (full MXU depth)
        return jnp.dot(ctx_scratch[...], wo_ref[...],
                       preferred_element_type=jnp.float32) + bo_ref[...]

    # 1) masked self-attention (fused QKV) + residual + LN1  (dropout = id)
    qkv = jnp.dot(x.astype(jnp.bfloat16), wqkv1[...],
                  preferred_element_type=jnp.float32) + bqkv1[...]
    sa = attention(qkv[:, :D], qkv[:, D:2 * D], qkv[:, 2 * D:],
                   wo1, bo1, trg_bias)
    x = _layer_norm(x + sa, g1[...], be1[...])

    # 2) cross-attention (q = x, k = enc_out, v = en_out) + residual + LN2
    q2 = jnp.dot(x.astype(jnp.bfloat16), wq2[...],
                 preferred_element_type=jnp.float32) + bq2[...]
    k2 = jnp.dot(ek.astype(jnp.bfloat16), wk2[...],
                 preferred_element_type=jnp.float32) + bk2[...]
    v2 = jnp.dot(ev.astype(jnp.bfloat16), wv2[...],
                 preferred_element_type=jnp.float32) + bv2[...]
    ca = attention(q2, k2, v2, wo2, bo2, src_bias)
    x = _layer_norm(x + ca, g2[...], be2[...])

    # 3) position-wise FFN (Linear -> ReLU -> Linear) + residual + LN3
    ff = _ffn(x, wff1, bff1, wff2, bff2, ff_chunk)
    x = _layer_norm(x + ff, g3[...], be3[...])

    out_ref[...] = x.reshape(Bb, S, D).astype(out_ref.dtype)


# kernel-arg order for the prepared parameters
KPARAMS = [
    "wqkv1", "bqkv1", "wo1", "bo1",
    "wq2", "bq2", "wk2", "bk2", "wv2", "bv2", "wo2", "bo2",
    "g1", "be1", "g2", "be2", "g3", "be3",
    "wff1", "bff1", "wff2", "bff2",
]


# ---------------------------------------------------------------------------
# wrapper helpers
# ---------------------------------------------------------------------------
def _vmem_capacity_bytes():
    """Physical VMEM per core (64 MiB conservative fallback)."""
    try:
        info = pltpu.get_tpu_info()
    except Exception:
        return 64 * 1024 * 1024
    for name in ("vmem_capacity_bytes", "vmem_bytes", "vmem_size_bytes"):
        v = getattr(info, name, None)
        if isinstance(v, int) and v > 0:
            return v
    return 64 * 1024 * 1024


def _auto_block_b(B, S, target_rows=256):
    """Smallest batch block reaching ~target_rows MXU rows, keeping grid>=2."""
    divs = [d for d in range(1, B + 1) if B % d == 0]
    if B >= 2:
        two_step = [d for d in divs if B // d >= 2]   # both v7x TCs get work
        if two_step:
            divs = two_step
    for d in divs:
        if d * S >= target_rows:
            return d
    return divs[-1]


def _prep_params(params):
    bf16, f32 = jnp.bfloat16, jnp.float32
    prep = {
        # fused self-attention QKV projection: one (D, 3D) matmul per block
        "wqkv1": jnp.concatenate(
            [params["wq1"], params["wk1"], params["wv1"]], axis=1).astype(bf16),
        "bqkv1": jnp.concatenate(
            [params["bq1"], params["bk1"], params["bv1"]], axis=1).astype(f32),
    }
    for n in ("wo1", "wq2", "wk2", "wv2", "wo2", "wff1", "wff2"):
        prep[n] = params[n].astype(bf16)
    for n in ("bo1", "bq2", "bk2", "bv2", "bo2",
              "g1", "be1", "g2", "be2", "g3", "be3", "bff1", "bff2"):
        prep[n] = params[n].astype(f32)
    return prep


def decoder_layer(x, enc_out, en_out, src_mask, trg_mask, params, n_head,
                  block_b=None, ff_chunk=512):
    """Fused decoder layer.

    src_mask: (B, S, S_enc) dense or (B, 1, S_enc) padding mask (1=keep).
    trg_mask: (B, S, S) dense, (B, 1, S), or None -> causal mask generated
              in-kernel (no O(S^2) mask HBM traffic).
    """
    B, S, D = x.shape
    S_enc = enc_out.shape[1]
    d_ff = params["wff1"].shape[1]
    assert D % n_head == 0
    causal_trg = trg_mask is None
    if d_ff > ff_chunk:
        assert ff_chunk % 128 == 0 and d_ff % ff_chunk == 0, (
            "ff_chunk must be a multiple of 128 and divide d_ff")

    if block_b is None:
        block_b = _auto_block_b(B, S)
    assert B % block_b == 0, "block_b must divide the batch size"
    grid = (B // block_b,)
    # NOTE: keep grid >= 2 when possible so v7x's two TensorCores both run;
    # and pick block_b so block_b*S >= ~256 rows for full MXU row utilization.

    prep = _prep_params(params)

    # exact {0,1} int8 masks (1 byte/elem; immune to bf16 rounding of '>0')
    smask_i8 = (src_mask > 0).astype(jnp.int8)
    if causal_trg:
        tmask_i8 = jnp.ones((B, 1, 1), jnp.int8)      # unused dummy block
    else:
        tmask_i8 = (trg_mask > 0).astype(jnp.int8)

    data_specs = [
        pl.BlockSpec((block_b, S, D), lambda b: (b, 0, 0)),        # x
        pl.BlockSpec((block_b, S_enc, D), lambda b: (b, 0, 0)),    # enc_out (K)
        pl.BlockSpec((block_b, S_enc, D), lambda b: (b, 0, 0)),    # en_out  (V)
        pl.BlockSpec((block_b,) + smask_i8.shape[1:], lambda b: (b, 0, 0)),
        pl.BlockSpec((block_b,) + tmask_i8.shape[1:], lambda b: (b, 0, 0)),
    ]
    # constant index_map: weights stay resident (Pallas double-buffers them)
    param_specs = [pl.BlockSpec(prep[n].shape, lambda b: (0, 0))
                   for n in KPARAMS]

    # ---- advisory cost estimate ------------------------------------------
    proj_flops = 2 * B * D * D * (6 * S + 2 * S_enc)
    attn_flops = 4 * B * S * D * (S + S_enc)
    ffn_flops = 4 * B * S * D * d_ff
    mask_elems_blk = (block_b * smask_i8.shape[1] * smask_i8.shape[2]
                      + block_b * tmask_i8.shape[1] * tmask_i8.shape[2])
    weight_bytes = 2 * (8 * D * D + 2 * D * d_ff) + 4 * (15 * D + d_ff)
    cost = pl.CostEstimate(
        flops=int(proj_flops + attn_flops + ffn_flops),
        transcendentals=int(B * n_head * S * (S + S_enc) + 8 * B * S),
        bytes_accessed=int(4 * B * D * (2 * S + 2 * S_enc)
                           + (B // block_b) * mask_elems_blk
                           + weight_bytes),
    )

    # ---- generation-aware VMEM budget --------------------------------------
    resident_weight_bytes = 2 * weight_bytes          # double-buffered weights
    io_bytes = 2 * (4 * block_b * D * (2 * S + 2 * S_enc) + mask_elems_blk)
    rows = block_b * S
    act_bytes = (4 * rows * (10 * D + min(ff_chunk, d_ff))   # f32 row temps
                 + 4 * S * max(S, S_enc) * 4                 # per-head scores
                 + 2 * rows * D)                              # bf16 ctx scratch
    est_vmem = resident_weight_bytes + io_bytes + act_bytes
    cap = _vmem_capacity_bytes()
    # headroom: 8 MiB on 64 MiB parts (v7x), ~16 MiB on 128 MiB parts (v5e/v6e)
    limit_cap = cap - max(8 << 20, cap // 8)
    vmem_limit = int(min(max(int(1.5 * est_vmem), 32 << 20), limit_cap))

    return pl.pallas_call(
        functools.partial(decoder_layer_kernel, n_head=n_head, block_b=block_b,
                          ff_chunk=ff_chunk, causal_trg=causal_trg),
        out_shape=jax.ShapeDtypeStruct((B, S, D), x.dtype),
        grid_spec=pltpu.PrefetchScalarGridSpec(
            num_scalar_prefetch=0,
            grid=grid,
            in_specs=data_specs + param_specs,
            out_specs=pl.BlockSpec((block_b, S, D), lambda b: (b, 0, 0)),
            scratch_shapes=[pltpu.VMEM((block_b * S, D), jnp.bfloat16)],
        ),
        compiler_params=pltpu.CompilerParams(
            dimension_semantics=("parallel",),
            vmem_limit_bytes=vmem_limit,
        ),
        cost_estimate=cost,
    )(x, enc_out, en_out, smask_i8, tmask_i8, *[prep[n] for n in KPARAMS])


# ---------------------------------------------------------------------------
# pure-JAX reference (mirrors the PyTorch forward, eval mode, f32)
# ---------------------------------------------------------------------------
def _mha_ref(xq, xk, xv, wq, bq, wk, bk, wv, bv, wo, bo, mask, n_head):
    B, Sq, D = xq.shape
    Sk = xk.shape[1]
    dh = D // n_head
    q = (xq @ wq + bq).reshape(B, Sq, n_head, dh).transpose(0, 2, 1, 3)
    k = (xk @ wk + bk).reshape(B, Sk, n_head, dh).transpose(0, 2, 1, 3)
    v = (xv @ wv + bv).reshape(B, Sk, n_head, dh).transpose(0, 2, 1, 3)
    s = jnp.einsum("bhqd,bhkd->bhqk", q, k) / jnp.sqrt(jnp.float32(dh))
    s = jnp.where(mask[:, None] > 0, s, NEG_INF)
    a = jax.nn.softmax(s, axis=-1)
    ctx = jnp.einsum("bhqk,bhkd->bhqd", a, v).transpose(0, 2, 1, 3).reshape(B, Sq, D)
    return ctx @ wo + bo


def _ln_ref(x, g, b):
    mean = jnp.mean(x, axis=-1, keepdims=True)
    var = jnp.mean((x - mean) ** 2, axis=-1, keepdims=True)
    return (x - mean) * jax.lax.rsqrt(var + LN_EPS) * g + b


def decoder_layer_ref(x, enc_out, en_out, src_mask, trg_mask, p, n_head):
    sa = _mha_ref(x, x, x, p["wq1"], p["bq1"], p["wk1"], p["bk1"],
                  p["wv1"], p["bv1"], p["wo1"], p["bo1"], trg_mask, n_head)
    x = _ln_ref(x + sa, p["g1"], p["be1"])
    ca = _mha_ref(x, enc_out, en_out, p["wq2"], p["bq2"], p["wk2"], p["bk2"],
                  p["wv2"], p["bv2"], p["wo2"], p["bo2"], src_mask, n_head)
    x = _ln_ref(x + ca, p["g2"], p["be2"])
    h = jnp.maximum(x @ p["wff1"] + p["bff1"], 0.0)
    ff = h @ p["wff2"] + p["bff2"]
    return _ln_ref(x + ff, p["g3"], p["be3"])


# ---------------------------------------------------------------------------
def make_params(key, d_model, d_dif):
    params = {}
    keys = jax.random.split(key, 16)
    ki = iter(keys)

    def w(shape):
        return (0.02 * jax.random.normal(next(ki), shape)).astype(jnp.float32)

    for pre in ("1", "2"):
        for name in ("wq", "wk", "wv", "wo"):
            params[name + pre] = w((d_model, d_model))
        for name in ("bq", "bk", "bv", "bo"):
            params[name + pre] = jnp.zeros((1, d_model), jnp.float32)
    for i in ("1", "2", "3"):
        params["g" + i] = jnp.ones((1, d_model), jnp.float32)
        params["be" + i] = jnp.zeros((1, d_model), jnp.float32)
    params["wff1"] = w((d_model, d_dif))
    params["bff1"] = jnp.zeros((1, d_dif), jnp.float32)
    params["wff2"] = w((d_dif, d_model))
    params["bff2"] = jnp.zeros((1, d_model), jnp.float32)
    return params


if __name__ == "__main__":
    B, S, S_enc = 2, 8, 8
    d_model, d_dif, n_head = 32, 64, 4

    key = jax.random.PRNGKey(0)
    kx, ke, kv_, kp = jax.random.split(key, 4)
    x = jax.random.normal(kx, (B, S, d_model), jnp.float32)
    enc_out = jax.random.normal(ke, (B, S_enc, d_model), jnp.float32)
    en_out = jax.random.normal(kv_, (B, S_enc, d_model), jnp.float32)

    # causal target mask, all-ones source mask (1.0 = keep, 0.0 = mask)
    trg_mask = jnp.tril(jnp.ones((S, S), jnp.float32))[None].repeat(B, axis=0)
    src_mask = jnp.ones((B, S, S_enc), jnp.float32)

    params = make_params(kp, d_model, d_dif)
    ref = decoder_layer_ref(x, enc_out, en_out, src_mask, trg_mask, params, n_head)

    cases = [
        # dense masks, auto block_b (keeps grid >= 2 -> block_b=1 here)
        ("dense/auto", src_mask, trg_mask, None),
        # dense masks, whole batch per grid step (exercises the block_b loop)
        ("dense/block_b=2", src_mask, trg_mask, 2),
        # compact masks: in-kernel causal trg mask + (B,1,S_enc) padding mask
        ("compact/causal", src_mask[:, :1, :], None, None),
    ]
    for name, sm, tm, bb in cases:
        out = decoder_layer(x, enc_out, en_out, sm, tm, params, n_head,
                            block_b=bb)
        out = jax.block_until_ready(out)
        assert out.shape == (B, S, d_model)
        max_err = float(jnp.max(jnp.abs(out - ref)))
        # bf16 MXU inputs + approx reciprocal -> slightly looser tolerance
        assert jnp.allclose(out, ref, rtol=2e-2, atol=2e-2), (
            f"{name}: mismatch vs reference (max_err={max_err})")

    print("KERNEL_OK")
</pallas_src>

<mosaic_0001>
module attributes {stable_mosaic.version = 11 : i64} {
  func.func @decoder_layer_kernel(%arg0: i32, %arg1: memref<1x8x32xf32, #tpu.memory_space<vmem>>, %arg2: memref<1x8x32xf32, #tpu.memory_space<vmem>>, %arg3: memref<1x8x32xf32, #tpu.memory_space<vmem>>, %arg4: memref<1x8x8xi8, #tpu.memory_space<vmem>>, %arg5: memref<1x8x8xi8, #tpu.memory_space<vmem>>, %arg6: memref<32x96xbf16, #tpu.memory_space<vmem>>, %arg7: memref<1x96xf32, #tpu.memory_space<vmem>>, %arg8: memref<32x32xbf16, #tpu.memory_space<vmem>>, %arg9: memref<1x32xf32, #tpu.memory_space<vmem>>, %arg10: memref<32x32xbf16, #tpu.memory_space<vmem>>, %arg11: memref<1x32xf32, #tpu.memory_space<vmem>>, %arg12: memref<32x32xbf16, #tpu.memory_space<vmem>>, %arg13: memref<1x32xf32, #tpu.memory_space<vmem>>, %arg14: memref<32x32xbf16, #tpu.memory_space<vmem>>, %arg15: memref<1x32xf32, #tpu.memory_space<vmem>>, %arg16: memref<32x32xbf16, #tpu.memory_space<vmem>>, %arg17: memref<1x32xf32, #tpu.memory_space<vmem>>, %arg18: memref<1x32xf32, #tpu.memory_space<vmem>>, %arg19: memref<1x32xf32, #tpu.memory_space<vmem>>, %arg20: memref<1x32xf32, #tpu.memory_space<vmem>>, %arg21: memref<1x32xf32, #tpu.memory_space<vmem>>, %arg22: memref<1x32xf32, #tpu.memory_space<vmem>>, %arg23: memref<1x32xf32, #tpu.memory_space<vmem>>, %arg24: memref<32x64xbf16, #tpu.memory_space<vmem>>, %arg25: memref<1x64xf32, #tpu.memory_space<vmem>>, %arg26: memref<64x32xbf16, #tpu.memory_space<vmem>>, %arg27: memref<1x32xf32, #tpu.memory_space<vmem>>, %arg28: memref<1x8x32xf32, #tpu.memory_space<vmem>>, %arg29: memref<8x32xbf16, #tpu.memory_space<vmem>>) attributes {dimension_semantics = [#tpu.dimension_semantics<parallel>], iteration_bounds = array<i64: 2>, scalar_prefetch = 0 : i64, scratch_operands = 1 : i64, tpu.core_type = #tpu.core_type<tc>, window_params = [{transform_indices = @transform_0, window_bounds = array<i64: 1, 8, 32>}, {transform_indices = @transform_1, window_bounds = array<i64: 1, 8, 32>}, {transform_indices = @transform_2, window_bounds = array<i64: 1, 8, 32>}, {transform_indices = @transform_3, window_bounds = array<i64: 1, 8, 8>}, {transform_indices = @transform_4, window_bounds = array<i64: 1, 8, 8>}, {pipeline_mode = #tpu.pipeline_mode<synchronous>, transform_indices = @transform_5, window_bounds = array<i64: 32, 96>}, {pipeline_mode = #tpu.pipeline_mode<synchronous>, transform_indices = @transform_6, window_bounds = array<i64: 1, 96>}, {pipeline_mode = #tpu.pipeline_mode<synchronous>, transform_indices = @transform_7, window_bounds = array<i64: 32, 32>}, {pipeline_mode = #tpu.pipeline_mode<synchronous>, transform_indices = @transform_8, window_bounds = array<i64: 1, 32>}, {pipeline_mode = #tpu.pipeline_mode<synchronous>, transform_indices = @transform_9, window_bounds = array<i64: 32, 32>}, {pipeline_mode = #tpu.pipeline_mode<synchronous>, transform_indices = @transform_10, window_bounds = array<i64: 1, 32>}, {pipeline_mode = #tpu.pipeline_mode<synchronous>, transform_indices = @transform_11, window_bounds = array<i64: 32, 32>}, {pipeline_mode = #tpu.pipeline_mode<synchronous>, transform_indices = @transform_12, window_bounds = array<i64: 1, 32>}, {pipeline_mode = #tpu.pipeline_mode<synchronous>, transform_indices = @transform_13, window_bounds = array<i64: 32, 32>}, {pipeline_mode = #tpu.pipeline_mode<synchronous>, transform_indices = @transform_14, window_bounds = array<i64: 1, 32>}, {pipeline_mode = #tpu.pipeline_mode<synchronous>, transform_indices = @transform_15, window_bounds = array<i64: 32, 32>}, {pipeline_mode = #tpu.pipeline_mode<synchronous>, transform_indices = @transform_16, window_bounds = array<i64: 1, 32>}, {pipeline_mode = #tpu.pipeline_mode<synchronous>, transform_indices = @transform_17, window_bounds = array<i64: 1, 32>}, {pipeline_mode = #tpu.pipeline_mode<synchronous>, transform_indices = @transform_18, window_bounds = array<i64: 1, 32>}, {pipeline_mode = #tpu.pipeline_mode<synchronous>, transform_indices = @transform_19, window_bounds = array<i64: 1, 32>}, {pipeline_mode = #tpu.pipeline_mode<synchronous>, transform_indices = @transform_20, window_bounds = array<i64: 1, 32>}, {pipeline_mode = #tpu.pipeline_mode<synchronous>, transform_indices = @transform_21, window_bounds = array<i64: 1, 32>}, {pipeline_mode = #tpu.pipeline_mode<synchronous>, transform_indices = @transform_22, window_bounds = array<i64: 1, 32>}, {pipeline_mode = #tpu.pipeline_mode<synchronous>, transform_indices = @transform_23, window_bounds = array<i64: 32, 64>}, {pipeline_mode = #tpu.pipeline_mode<synchronous>, transform_indices = @transform_24, window_bounds = array<i64: 1, 64>}, {pipeline_mode = #tpu.pipeline_mode<synchronous>, transform_indices = @transform_25, window_bounds = array<i64: 64, 32>}, {pipeline_mode = #tpu.pipeline_mode<synchronous>, transform_indices = @transform_26, window_bounds = array<i64: 1, 32>}, {transform_indices = @transform_27, window_bounds = array<i64: 1, 8, 32>}]} {
    %c0 = arith.constant 0 : index
    %c0_0 = arith.constant 0 : index
    %c0_1 = arith.constant 0 : index
    %0 = vector.load %arg1[%c0, %c0_0, %c0_1] : memref<1x8x32xf32, #tpu.memory_space<vmem>>, vector<1x8x32xf32>
    %1 = vector.shape_cast %0 : vector<1x8x32xf32> to vector<8x32xf32>
    %c0_2 = arith.constant 0 : index
    %c0_3 = arith.constant 0 : index
    %c0_4 = arith.constant 0 : index
    %2 = vector.load %arg2[%c0_2, %c0_3, %c0_4] : memref<1x8x32xf32, #tpu.memory_space<vmem>>, vector<1x8x32xf32>
    %3 = vector.shape_cast %2 : vector<1x8x32xf32> to vector<8x32xf32>
    %c0_5 = arith.constant 0 : index
    %c0_6 = arith.constant 0 : index
    %c0_7 = arith.constant 0 : index
    %4 = vector.load %arg3[%c0_5, %c0_6, %c0_7] : memref<1x8x32xf32, #tpu.memory_space<vmem>>, vector<1x8x32xf32>
    %5 = vector.shape_cast %4 : vector<1x8x32xf32> to vector<8x32xf32>
    %6 = arith.truncf %1 : vector<8x32xf32> to vector<8x32xbf16>
    %c0_8 = arith.constant 0 : index
    %c0_9 = arith.constant 0 : index
    %7 = vector.load %arg6[%c0_8, %c0_9] : memref<32x96xbf16, #tpu.memory_space<vmem>>, vector<32x96xbf16>
    %cst = arith.constant dense<0.000000e+00> : vector<8x96xf32>
    %8 = tpu.matmul %6, %7, %cst {dimension_numbers = #tpu.dot_dimension_numbers<[1], [0], [0], [1], [0, 0, 1, 1], [], []>} : vector<8x32xbf16>, vector<32x96xbf16>, vector<8x96xf32> -> vector<8x96xf32>
    %c0_10 = arith.constant 0 : index
    %c0_11 = arith.constant 0 : index
    %9 = vector.load %arg7[%c0_10, %c0_11] : memref<1x96xf32, #tpu.memory_space<vmem>>, vector<1x96xf32>
    %10 = vector.broadcast %9 : vector<1x96xf32> to vector<8x96xf32>
    %11 = arith.addf %8, %10 : vector<8x96xf32>
    %12 = vector.extract_strided_slice %11 {offsets = [0, 0], sizes = [8, 32], strides = [1, 1]} : vector<8x96xf32> to vector<8x32xf32>
    %13 = vector.extract_strided_slice %11 {offsets = [0, 32], sizes = [8, 32], strides = [1, 1]} : vector<8x96xf32> to vector<8x32xf32>
    %14 = vector.extract_strided_slice %11 {offsets = [0, 64], sizes = [8, 32], strides = [1, 1]} : vector<8x96xf32> to vector<8x32xf32>
    %cst_12 = arith.constant 0.353553385 : f32
    %15 = vector.broadcast %cst_12 : f32 to vector<8x32xf32>
    %16 = arith.mulf %12, %15 : vector<8x32xf32>
    %17 = arith.truncf %16 : vector<8x32xf32> to vector<8x32xbf16>
    %18 = arith.truncf %13 : vector<8x32xf32> to vector<8x32xbf16>
    %19 = arith.truncf %14 : vector<8x32xf32> to vector<8x32xbf16>
    %c0_13 = arith.constant 0 : index
    %c0_14 = arith.constant 0 : index
    %c0_15 = arith.constant 0 : index
    %20 = vector.load %arg5[%c0_13, %c0_14, %c0_15] : memref<1x8x8xi8, #tpu.memory_space<vmem>>, vector<1x8x8xi8>
    %21 = vector.shape_cast %20 : vector<1x8x8xi8> to vector<8x8xi8>
    %22 = arith.sitofp %21 : vector<8x8xi8> to vector<8x8xf32>
    %cst_16 = arith.constant 0.000000e+00 : f32
    %23 = vector.broadcast %cst_16 : f32 to vector<8x8xf32>
    %24 = arith.cmpf ogt, %22, %23 : vector<8x8xf32>
    %cst_17 = arith.constant 0.000000e+00 : f32
    %cst_18 = arith.constant -1.000000e+09 : f32
    %25 = vector.broadcast %cst_17 : f32 to vector<8x8xf32>
    %26 = vector.broadcast %cst_18 : f32 to vector<8x8xf32>
    %27 = arith.select %24, %25, %26 : vector<8x8xi1>, vector<8x8xf32>
    %28 = vector.extract_strided_slice %17 {offsets = [0, 0], sizes = [8, 8], strides = [1, 1]} : vector<8x32xbf16> to vector<8x8xbf16>
    %29 = vector.extract_strided_slice %18 {offsets = [0, 0], sizes = [8, 8], strides = [1, 1]} : vector<8x32xbf16> to vector<8x8xbf16>
    %30 = vector.extract_strided_slice %19 {offsets = [0, 0], sizes = [8, 8], strides = [1, 1]} : vector<8x32xbf16> to vector<8x8xbf16>
    %cst_19 = arith.constant dense<0.000000e+00> : vector<8x8xf32>
    %31 = tpu.matmul %28, %29, %cst_19 {dimension_numbers = #tpu.dot_dimension_numbers<[1], [1], [0], [0], [0, 0, 1, 0], [], []>} : vector<8x8xbf16>, vector<8x8xbf16>, vector<8x8xf32> -> vector<8x8xf32>
    %32 = arith.addf %31, %27 : vector<8x8xf32>
    %cst_20 = arith.constant dense<0xFF800000> : vector<8xf32>
    %33 = vector.multi_reduction <maximumf>, %32, %cst_20 [1] : vector<8x8xf32> to vector<8xf32>
    %34 = vector.shape_cast %33 : vector<8xf32> to vector<8x1xf32>
    %35 = vector.broadcast %34 : vector<8x1xf32> to vector<8x8xf32>
    %36 = arith.subf %32, %35 : vector<8x8xf32>
    %37 = math.exp %36 : vector<8x8xf32>
    %cst_21 = arith.constant dense<0.000000e+00> : vector<8xf32>
    %38 = vector.multi_reduction <add>, %37, %cst_21 [1] : vector<8x8xf32> to vector<8xf32>
    %39 = vector.shape_cast %38 : vector<8xf32> to vector<8x1xf32>
    %40 = arith.truncf %37 : vector<8x8xf32> to vector<8x8xbf16>
    %cst_22 = arith.constant dense<0.000000e+00> : vector<8x8xf32>
    %41 = tpu.matmul %40, %30, %cst_22 {dimension_numbers = #tpu.dot_dimension_numbers<[1], [0], [0], [1], [0, 0, 1, 1], [], []>} : vector<8x8xbf16>, vector<8x8xbf16>, vector<8x8xf32> -> vector<8x8xf32>
    %42 = tpu.reciprocal %39 {approx = true} : vector<8x1xf32> -> vector<8x1xf32>
    %43 = vector.broadcast %42 : vector<8x1xf32> to vector<8x8xf32>
    %44 = arith.mulf %41, %43 : vector<8x8xf32>
    %45 = arith.truncf %44 : vector<8x8xf32> to vector<8x8xbf16>
    %c0_23 = arith.constant 0 : index
    %c0_24 = arith.constant 0 : index
    %46 = vector.load %arg29[%c0_23, %c0_24] : memref<8x32xbf16, #tpu.memory_space<vmem>>, vector<8x8xbf16>
    tpu.vector_store %arg29[%c0_23, %c0_24], %45 {strides = array<i32>} : memref<8x32xbf16, #tpu.memory_space<vmem>>, vector<8x8xbf16>,
    %47 = vector.extract_strided_slice %17 {offsets = [0, 8], sizes = [8, 8], strides = [1, 1]} : vector<8x32xbf16> to vector<8x8xbf16>
    %48 = vector.extract_strided_slice %18 {offsets = [0, 8], sizes = [8, 8], strides = [1, 1]} : vector<8x32xbf16> to vector<8x8xbf16>
    %49 = vector.extract_strided_slice %19 {offsets = [0, 8], sizes = [8, 8], strides = [1, 1]} : vector<8x32xbf16> to vector<8x8xbf16>
    %cst_25 = arith.constant dense<0.000000e+00> : vector<8x8xf32>
    %50 = tpu.matmul %47, %48, %cst_25 {dimension_numbers = #tpu.dot_dimension_numbers<[1], [1], [0], [0], [0, 0, 1, 0], [], []>} : vector<8x8xbf16>, vector<8x8xbf16>, vector<8x8xf32> -> vector<8x8xf32>
    %51 = arith.addf %50, %27 : vector<8x8xf32>
    %cst_26 = arith.constant dense<0xFF800000> : vector<8xf32>
    %52 = vector.multi_reduction <maximumf>, %51, %cst_26 [1] : vector<8x8xf32> to vector<8xf32>
    %53 = vector.shape_cast %52 : vector<8xf32> to vector<8x1xf32>
    %54 = vector.broadcast %53 : vector<8x1xf32> to vector<8x8xf32>
    %55 = arith.subf %51, %54 : vector<8x8xf32>
    %56 = math.exp %55 : vector<8x8xf32>
    %cst_27 = arith.constant dense<0.000000e+00> : vector<8xf32>
    %57 = vector.multi_reduction <add>, %56, %cst_27 [1] : vector<8x8xf32> to vector<8xf32>
    %58 = vector.shape_cast %57 : vector<8xf32> to vector<8x1xf32>
    %59 = arith.truncf %56 : vector<8x8xf32> to vector<8x8xbf16>
    %cst_28 = arith.constant dense<0.000000e+00> : vector<8x8xf32>
    %60 = tpu.matmul %59, %49, %cst_28 {dimension_numbers = #tpu.dot_dimension_numbers<[1], [0], [0], [1], [0, 0, 1, 1], [], []>} : vector<8x8xbf16>, vector<8x8xbf16>, vector<8x8xf32> -> vector<8x8xf32>
    %61 = tpu.reciprocal %58 {approx = true} : vector<8x1xf32> -> vector<8x1xf32>
    %62 = vector.broadcast %61 : vector<8x1xf32> to vector<8x8xf32>
    %63 = arith.mulf %60, %62 : vector<8x8xf32>
    %64 = arith.truncf %63 : vector<8x8xf32> to vector<8x8xbf16>
    %c0_29 = arith.constant 0 : index
    %c8 = arith.constant 8 : index
    %65 = vector.load %arg29[%c0_29, %c8] : memref<8x32xbf16, #tpu.memory_space<vmem>>, vector<8x8xbf16>
    tpu.vector_store %arg29[%c0_29, %c8], %64 {strides = array<i32>} : memref<8x32xbf16, #tpu.memory_space<vmem>>, vector<8x8xbf16>,
    %66 = vector.extract_strided_slice %17 {offsets = [0, 16], sizes = [8, 8], strides = [1, 1]} : vector<8x32xbf16> to vector<8x8xbf16>
    %67 = vector.extract_strided_slice %18 {offsets = [0, 16], sizes = [8, 8], strides = [1, 1]} : vector<8x32xbf16> to vector<8x8xbf16>
    %68 = vector.extract_strided_slice %19 {offsets = [0, 16], sizes = [8, 8], strides = [1, 1]} : vector<8x32xbf16> to vector<8x8xbf16>
    %cst_30 = arith.constant dense<0.000000e+00> : vector<8x8xf32>
    %69 = tpu.matmul %66, %67, %cst_30 {dimension_numbers = #tpu.dot_dimension_numbers<[1], [1], [0], [0], [0, 0, 1, 0], [], []>} : vector<8x8xbf16>, vector<8x8xbf16>, vector<8x8xf32> -> vector<8x8xf32>
    %70 = arith.addf %69, %27 : vector<8x8xf32>
    %cst_31 = arith.constant dense<0xFF800000> : vector<8xf32>
    %71 = vector.multi_reduction <maximumf>, %70, %cst_31 [1] : vector<8x8xf32> to vector<8xf32>
    %72 = vector.shape_cast %71 : vector<8xf32> to vector<8x1xf32>
    %73 = vector.broadcast %72 : vector<8x1xf32> to vector<8x8xf32>
    %74 = arith.subf %70, %73 : vector<8x8xf32>
    %75 = math.exp %74 : vector<8x8xf32>
    %cst_32 = arith.constant dense<0.000000e+00> : vector<8xf32>
    %76 = vector.multi_reduction <add>, %75, %cst_32 [1] : vector<8x8xf32> to vector<8xf32>
    %77 = vector.shape_cast %76 : vector<8xf32> to vector<8x1xf32>
    %78 = arith.truncf %75 : vector<8x8xf32> to vector<8x8xbf16>
    %cst_33 = arith.constant dense<0.000000e+00> : vector<8x8xf32>
    %79 = tpu.matmul %78, %68, %cst_33 {dimension_numbers = #tpu.dot_dimension_numbers<[1], [0], [0], [1], [0, 0, 1, 1], [], []>} : vector<8x8xbf16>, vector<8x8xbf16>, vector<8x8xf32> -> vector<8x8xf32>
    %80 = tpu.reciprocal %77 {approx = true} : vector<8x1xf32> -> vector<8x1xf32>
    %81 = vector.broadcast %80 : vector<8x1xf32> to vector<8x8xf32>
    %82 = arith.mulf %79, %81 : vector<8x8xf32>
    %83 = arith.truncf %82 : vector<8x8xf32> to vector<8x8xbf16>
    %c0_34 = arith.constant 0 : index
    %c16 = arith.constant 16 : index
    %84 = vector.load %arg29[%c0_34, %c16] : memref<8x32xbf16, #tpu.memory_space<vmem>>, vector<8x8xbf16>
    tpu.vector_store %arg29[%c0_34, %c16], %83 {strides = array<i32>} : memref<8x32xbf16, #tpu.memory_space<vmem>>, vector<8x8xbf16>,
    %85 = vector.extract_strided_slice %17 {offsets = [0, 24], sizes = [8, 8], strides = [1, 1]} : vector<8x32xbf16> to vector<8x8xbf16>
    %86 = vector.extract_strided_slice %18 {offsets = [0, 24], sizes = [8, 8], strides = [1, 1]} : vector<8x32xbf16> to vector<8x8xbf16>
    %87 = vector.extract_strided_slice %19 {offsets = [0, 24], sizes = [8, 8], strides = [1, 1]} : vector<8x32xbf16> to vector<8x8xbf16>
    %cst_35 = arith.constant dense<0.000000e+00> : vector<8x8xf32>
    %88 = tpu.matmul %85, %86, %cst_35 {dimension_numbers = #tpu.dot_dimension_numbers<[1], [1], [0], [0], [0, 0, 1, 0], [], []>} : vector<8x8xbf16>, vector<8x8xbf16>, vector<8x8xf32> -> vector<8x8xf32>
    %89 = arith.addf %88, %27 : vector<8x8xf32>
    %cst_36 = arith.constant dense<0xFF800000> : vector<8xf32>
    %90 = vector.multi_reduction <maximumf>, %89, %cst_36 [1] : vector<8x8xf32> to vector<8xf32>
    %91 = vector.shape_cast %90 : vector<8xf32> to vector<8x1xf32>
    %92 = vector.broadcast %91 : vector<8x1xf32> to vector<8x8xf32>
    %93 = arith.subf %89, %92 : vector<8x8xf32>
    %94 = math.exp %93 : vector<8x8xf32>
    %cst_37 = arith.constant dense<0.000000e+00> : vector<8xf32>
    %95 = vector.multi_reduction <add>, %94, %cst_37 [1] : vector<8x8xf32> to vector<8xf32>
    %96 = vector.shape_cast %95 : vector<8xf32> to vector<8x1xf32>
    %97 = arith.truncf %94 : vector<8x8xf32> to vector<8x8xbf16>
    %cst_38 = arith.constant dense<0.000000e+00> : vector<8x8xf32>
    %98 = tpu.matmul %97, %87, %cst_38 {dimension_numbers = #tpu.dot_dimension_numbers<[1], [0], [0], [1], [0, 0, 1, 1], [], []>} : vector<8x8xbf16>, vector<8x8xbf16>, vector<8x8xf32> -> vector<8x8xf32>
    %99 = tpu.reciprocal %96 {approx = true} : vector<8x1xf32> -> vector<8x1xf32>
    %100 = vector.broadcast %99 : vector<8x1xf32> to vector<8x8xf32>
    %101 = arith.mulf %98, %100 : vector<8x8xf32>
    %102 = arith.truncf %101 : vector<8x8xf32> to vector<8x8xbf16>
    %c0_39 = arith.constant 0 : index
    %c24 = arith.constant 24 : index
    %103 = vector.load %arg29[%c0_39, %c24] : memref<8x32xbf16, #tpu.memory_space<vmem>>, vector<8x8xbf16>
    tpu.vector_store %arg29[%c0_39, %c24], %102 {strides = array<i32>} : memref<8x32xbf16, #tpu.memory_space<vmem>>, vector<8x8xbf16>,
    %c0_40 = arith.constant 0 : index
    %c0_41 = arith.constant 0 : index
    %104 = vector.load %arg29[%c0_40, %c0_41] : memref<8x32xbf16, #tpu.memory_space<vmem>>, vector<8x32xbf16>
    %c0_42 = arith.constant 0 : index
    %c0_43 = arith.constant 0 : index
    %105 = vector.load %arg8[%c0_42, %c0_43] : memref<32x32xbf16, #tpu.memory_space<vmem>>, vector<32x32xbf16>
    %cst_44 = arith.constant dense<0.000000e+00> : vector<8x32xf32>
    %106 = tpu.matmul %104, %105, %cst_44 {dimension_numbers = #tpu.dot_dimension_numbers<[1], [0], [0], [1], [0, 0, 1, 1], [], []>} : vector<8x32xbf16>, vector<32x32xbf16>, vector<8x32xf32> -> vector<8x32xf32>
    %c0_45 = arith.constant 0 : index
    %c0_46 = arith.constant 0 : index
    %107 = vector.load %arg9[%c0_45, %c0_46] : memref<1x32xf32, #tpu.memory_space<vmem>>, vector<1x32xf32>
    %108 = vector.broadcast %107 : vector<1x32xf32> to vector<8x32xf32>
    %109 = arith.addf %106, %108 : vector<8x32xf32>
    %110 = arith.addf %1, %109 : vector<8x32xf32>
    %c0_47 = arith.constant 0 : index
    %c0_48 = arith.constant 0 : index
    %111 = vector.load %arg18[%c0_47, %c0_48] : memref<1x32xf32, #tpu.memory_space<vmem>>, vector<1x32xf32>
    %c0_49 = arith.constant 0 : index
    %c0_50 = arith.constant 0 : index
    %112 = vector.load %arg19[%c0_49, %c0_50] : memref<1x32xf32, #tpu.memory_space<vmem>>, vector<1x32xf32>
    %cst_51 = arith.constant dense<0.000000e+00> : vector<8xf32>
    %113 = vector.multi_reduction <add>, %110, %cst_51 [1] : vector<8x32xf32> to vector<8xf32>
    %114 = vector.shape_cast %113 : vector<8xf32> to vector<8x1xf32>
    %cst_52 = arith.constant 3.200000e+01 : f32
    %115 = vector.broadcast %cst_52 : f32 to vector<8x1xf32>
    %116 = arith.divf %114, %115 : vector<8x1xf32>
    %117 = vector.broadcast %116 : vector<8x1xf32> to vector<8x32xf32>
    %118 = arith.subf %110, %117 : vector<8x32xf32>
    %119 = arith.mulf %118, %118 : vector<8x32xf32>
    %cst_53 = arith.constant dense<0.000000e+00> : vector<8xf32>
    %120 = vector.multi_reduction <add>, %119, %cst_53 [1] : vector<8x32xf32> to vector<8xf32>
    %121 = vector.shape_cast %120 : vector<8xf32> to vector<8x1xf32>
    %cst_54 = arith.constant 3.200000e+01 : f32
    %122 = vector.broadcast %cst_54 : f32 to vector<8x1xf32>
    %123 = arith.divf %121, %122 : vector<8x1xf32>
    %cst_55 = arith.constant 9.99999996E-13 : f32
    %124 = vector.broadcast %cst_55 : f32 to vector<8x1xf32>
    %125 = arith.addf %123, %124 : vector<8x1xf32>
    %126 = math.rsqrt %125 : vector<8x1xf32>
    %127 = vector.broadcast %126 : vector<8x1xf32> to vector<8x32xf32>
    %128 = arith.mulf %118, %127 : vector<8x32xf32>
    %129 = vector.broadcast %111 : vector<1x32xf32> to vector<8x32xf32>
    %130 = arith.mulf %128, %129 : vector<8x32xf32>
    %131 = vector.broadcast %112 : vector<1x32xf32> to vector<8x32xf32>
    %132 = arith.addf %130, %131 : vector<8x32xf32>
    %133 = arith.truncf %132 : vector<8x32xf32> to vector<8x32xbf16>
    %c0_56 = arith.constant 0 : index
    %c0_57 = arith.constant 0 : index
    %134 = vector.load %arg10[%c0_56, %c0_57] : memref<32x32xbf16, #tpu.memory_space<vmem>>, vector<32x32xbf16>
    %cst_58 = arith.constant dense<0.000000e+00> : vector<8x32xf32>
    %135 = tpu.matmul %133, %134, %cst_58 {dimension_numbers = #tpu.dot_dimension_numbers<[1], [0], [0], [1], [0, 0, 1, 1], [], []>} : vector<8x32xbf16>, vector<32x32xbf16>, vector<8x32xf32> -> vector<8x32xf32>
    %c0_59 = arith.constant 0 : index
    %c0_60 = arith.constant 0 : index
    %136 = vector.load %arg11[%c0_59, %c0_60] : memref<1x32xf32, #tpu.memory_space<vmem>>, vector<1x32xf32>
    %137 = vector.broadcast %136 : vector<1x32xf32> to vector<8x32xf32>
    %138 = arith.addf %135, %137 : vector<8x32xf32>
    %139 = arith.truncf %3 : vector<8x32xf32> to vector<8x32xbf16>
    %c0_61 = arith.constant 0 : index
    %c0_62 = arith.constant 0 : index
    %140 = vector.load %arg12[%c0_61, %c0_62] : memref<32x32xbf16, #tpu.memory_space<vmem>>, vector<32x32xbf16>
    %cst_63 = arith.constant dense<0.000000e+00> : vector<8x32xf32>
    %141 = tpu.matmul %139, %140, %cst_63 {dimension_numbers = #tpu.dot_dimension_numbers<[1], [0], [0], [1], [0, 0, 1, 1], [], []>} : vector<8x32xbf16>, vector<32x32xbf16>, vector<8x32xf32> -> vector<8x32xf32>
    %c0_64 = arith.constant 0 : index
    %c0_65 = arith.constant 0 : index
    %142 = vector.load %arg13[%c0_64, %c0_65] : memref<1x32xf32, #tpu.memory_space<vmem>>, vector<1x32xf32>
    %143 = vector.broadcast %142 : vector<1x32xf32> to vector<8x32xf32>
    %144 = arith.addf %141, %143 : vector<8x32xf32>
    %145 = arith.truncf %5 : vector<8x32xf32> to vector<8x32xbf16>
    %c0_66 = arith.constant 0 : index
    %c0_67 = arith.constant 0 : index
    %146 = vector.load %arg14[%c0_66, %c0_67] : memref<32x32xbf16, #tpu.memory_space<vmem>>, vector<32x32xbf16>
    %cst_68 = arith.constant dense<0.000000e+00> : vector<8x32xf32>
    %147 = tpu.matmul %145, %146, %cst_68 {dimension_numbers = #tpu.dot_dimension_numbers<[1], [0], [0], [1], [0, 0, 1, 1], [], []>} : vector<8x32xbf16>, vector<32x32xbf16>, vector<8x32xf32> -> vector<8x32xf32>
    %c0_69 = arith.constant 0 : index
    %c0_70 = arith.constant 0 : index
    %148 = vector.load %arg15[%c0_69, %c0_70] : memref<1x32xf32, #tpu.memory_space<vmem>>, vector<1x32xf32>
    %149 = vector.broadcast %148 : vector<1x32xf32> to vector<8x32xf32>
    %150 = arith.addf %147, %149 : vector<8x32xf32>
    %cst_71 = arith.constant 0.353553385 : f32
    %151 = vector.broadcast %cst_71 : f32 to vector<8x32xf32>
    %152 = arith.mulf %138, %151 : vector<8x32xf32>
    %153 = arith.truncf %152 : vector<8x32xf32> to vector<8x32xbf16>
    %154 = arith.truncf %144 : vector<8x32xf32> to vector<8x32xbf16>
    %155 = arith.truncf %150 : vector<8x32xf32> to vector<8x32xbf16>
    %c0_72 = arith.constant 0 : index
    %c0_73 = arith.constant 0 : index
    %c0_74 = arith.constant 0 : index
    %156 = vector.load %arg4[%c0_72, %c0_73, %c0_74] : memref<1x8x8xi8, #tpu.memory_space<vmem>>, vector<1x8x8xi8>
    %157 = vector.shape_cast %156 : vector<1x8x8xi8> to vector<8x8xi8>
    %158 = arith.sitofp %157 : vector<8x8xi8> to vector<8x8xf32>
    %cst_75 = arith.constant 0.000000e+00 : f32
    %159 = vector.broadcast %cst_75 : f32 to vector<8x8xf32>
    %160 = arith.cmpf ogt, %158, %159 : vector<8x8xf32>
    %cst_76 = arith.constant 0.000000e+00 : f32
    %cst_77 = arith.constant -1.000000e+09 : f32
    %161 = vector.broadcast %cst_76 : f32 to vector<8x8xf32>
    %162 = vector.broadcast %cst_77 : f32 to vector<8x8xf32>
    %163 = arith.select %160, %161, %162 : vector<8x8xi1>, vector<8x8xf32>
    %164 = vector.extract_strided_slice %153 {offsets = [0, 0], sizes = [8, 8], strides = [1, 1]} : vector<8x32xbf16> to vector<8x8xbf16>
    %165 = vector.extract_strided_slice %154 {offsets = [0, 0], sizes = [8, 8], strides = [1, 1]} : vector<8x32xbf16> to vector<8x8xbf16>
    %166 = vector.extract_strided_slice %155 {offsets = [0, 0], sizes = [8, 8], strides = [1, 1]} : vector<8x32xbf16> to vector<8x8xbf16>
    %cst_78 = arith.constant dense<0.000000e+00> : vector<8x8xf32>
    %167 = tpu.matmul %164, %165, %cst_78 {dimension_numbers = #tpu.dot_dimension_numbers<[1], [1], [0], [0], [0, 0, 1, 0], [], []>} : vector<8x8xbf16>, vector<8x8xbf16>, vector<8x8xf32> -> vector<8x8xf32>
    %168 = arith.addf %167, %163 : vector<8x8xf32>
    %cst_79 = arith.constant dense<0xFF800000> : vector<8xf32>
    %169 = vector.multi_reduction <maximumf>, %168, %cst_79 [1] : vector<8x8xf32> to vector<8xf32>
    %170 = vector.shape_cast %169 : vector<8xf32> to vector<8x1xf32>
    %171 = vector.broadcast %170 : vector<8x1xf32> to vector<8x8xf32>
    %172 = arith.subf %168, %171 : vector<8x8xf32>
    %173 = math.exp %172 : vector<8x8xf32>
    %cst_80 = arith.constant dense<0.000000e+00> : vector<8xf32>
    %174 = vector.multi_reduction <add>, %173, %cst_80 [1] : vector<8x8xf32> to vector<8xf32>
    %175 = vector.shape_cast %174 : vector<8xf32> to vector<8x1xf32>
    %176 = arith.truncf %173 : vector<8x8xf32> to vector<8x8xbf16>
    %cst_81 = arith.constant dense<0.000000e+00> : vector<8x8xf32>
    %177 = tpu.matmul %176, %166, %cst_81 {dimension_numbers = #tpu.dot_dimension_numbers<[1], [0], [0], [1], [0, 0, 1, 1], [], []>} : vector<8x8xbf16>, vector<8x8xbf16>, vector<8x8xf32> -> vector<8x8xf32>
    %178 = tpu.reciprocal %175 {approx = true} : vector<8x1xf32> -> vector<8x1xf32>
    %179 = vector.broadcast %178 : vector<8x1xf32> to vector<8x8xf32>
    %180 = arith.mulf %177, %179 : vector<8x8xf32>
    %181 = arith.truncf %180 : vector<8x8xf32> to vector<8x8xbf16>
    %c0_82 = arith.constant 0 : index
    %c0_83 = arith.constant 0 : index
    %182 = vector.load %arg29[%c0_82, %c0_83] : memref<8x32xbf16, #tpu.memory_space<vmem>>, vector<8x8xbf16>
    tpu.vector_store %arg29[%c0_82, %c0_83], %181 {strides = array<i32>} : memref<8x32xbf16, #tpu.memory_space<vmem>>, vector<8x8xbf16>,
    %183 = vector.extract_strided_slice %153 {offsets = [0, 8], sizes = [8, 8], strides = [1, 1]} : vector<8x32xbf16> to vector<8x8xbf16>
    %184 = vector.extract_strided_slice %154 {offsets = [0, 8], sizes = [8, 8], strides = [1, 1]} : vector<8x32xbf16> to vector<8x8xbf16>
    %185 = vector.extract_strided_slice %155 {offsets = [0, 8], sizes = [8, 8], strides = [1, 1]} : vector<8x32xbf16> to vector<8x8xbf16>
    %cst_84 = arith.constant dense<0.000000e+00> : vector<8x8xf32>
    %186 = tpu.matmul %183, %184, %cst_84 {dimension_numbers = #tpu.dot_dimension_numbers<[1], [1], [0], [0], [0, 0, 1, 0], [], []>} : vector<8x8xbf16>, vector<8x8xbf16>, vector<8x8xf32> -> vector<8x8xf32>
    %187 = arith.addf %186, %163 : vector<8x8xf32>
    %cst_85 = arith.constant dense<0xFF800000> : vector<8xf32>
    %188 = vector.multi_reduction <maximumf>, %187, %cst_85 [1] : vector<8x8xf32> to vector<8xf32>
    %189 = vector.shape_cast %188 : vector<8xf32> to vector<8x1xf32>
    %190 = vector.broadcast %189 : vector<8x1xf32> to vector<8x8xf32>
    %191 = arith.subf %187, %190 : vector<8x8xf32>
    %192 = math.exp %191 : vector<8x8xf32>
    %cst_86 = arith.constant dense<0.000000e+00> : vector<8xf32>
    %193 = vector.multi_reduction <add>, %192, %cst_86 [1] : vector<8x8xf32> to vector<8xf32>
    %194 = vector.shape_cast %193 : vector<8xf32> to vector<8x1xf32>
    %195 = arith.truncf %192 : vector<8x8xf32> to vector<8x8xbf16>
    %cst_87 = arith.constant dense<0.000000e+00> : vector<8x8xf32>
    %196 = tpu.matmul %195, %185, %cst_87 {dimension_numbers = #tpu.dot_dimension_numbers<[1], [0], [0], [1], [0, 0, 1, 1], [], []>} : vector<8x8xbf16>, vector<8x8xbf16>, vector<8x8xf32> -> vector<8x8xf32>
    %197 = tpu.reciprocal %194 {approx = true} : vector<8x1xf32> -> vector<8x1xf32>
    %198 = vector.broadcast %197 : vector<8x1xf32> to vector<8x8xf32>
    %199 = arith.mulf %196, %198 : vector<8x8xf32>
    %200 = arith.truncf %199 : vector<8x8xf32> to vector<8x8xbf16>
    %c0_88 = arith.constant 0 : index
    %c8_89 = arith.constant 8 : index
    %201 = vector.load %arg29[%c0_88, %c8_89] : memref<8x32xbf16, #tpu.memory_space<vmem>>, vector<8x8xbf16>
    tpu.vector_store %arg29[%c0_88, %c8_89], %200 {strides = array<i32>} : memref<8x32xbf16, #tpu.memory_space<vmem>>, vector<8x8xbf16>,
    %202 = vector.extract_strided_slice %153 {offsets = [0, 16], sizes = [8, 8], strides = [1, 1]} : vector<8x32xbf16> to vector<8x8xbf16>
    %203 = vector.extract_strided_slice %154 {offsets = [0, 16], sizes = [8, 8], strides = [1, 1]} : vector<8x32xbf16> to vector<8x8xbf16>
    %204 = vector.extract_strided_slice %155 {offsets = [0, 16], sizes = [8, 8], strides = [1, 1]} : vector<8x32xbf16> to vector<8x8xbf16>
    %cst_90 = arith.constant dense<0.000000e+00> : vector<8x8xf32>
    %205 = tpu.matmul %202, %203, %cst_90 {dimension_numbers = #tpu.dot_dimension_numbers<[1], [1], [0], [0], [0, 0, 1, 0], [], []>} : vector<8x8xbf16>, vector<8x8xbf16>, vector<8x8xf32> -> vector<8x8xf32>
    %206 = arith.addf %205, %163 : vector<8x8xf32>
    %cst_91 = arith.constant dense<0xFF800000> : vector<8xf32>
    %207 = vector.multi_reduction <maximumf>, %206, %cst_91 [1] : vector<8x8xf32> to vector<8xf32>
    %208 = vector.shape_cast %207 : vector<8xf32> to vector<8x1xf32>
    %209 = vector.broadcast %208 : vector<8x1xf32> to vector<8x8xf32>
    %210 = arith.subf %206, %209 : vector<8x8xf32>
    %211 = math.exp %210 : vector<8x8xf32>
    %cst_92 = arith.constant dense<0.000000e+00> : vector<8xf32>
    %212 = vector.multi_reduction <add>, %211, %cst_92 [1] : vector<8x8xf32> to vector<8xf32>
    %213 = vector.shape_cast %212 : vector<8xf32> to vector<8x1xf32>
    %214 = arith.truncf %211 : vector<8x8xf32> to vector<8x8xbf16>
    %cst_93 = arith.constant dense<0.000000e+00> : vector<8x8xf32>
    %215 = tpu.matmul %214, %204, %cst_93 {dimension_numbers = #tpu.dot_dimension_numbers<[1], [0], [0], [1], [0, 0, 1, 1], [], []>} : vector<8x8xbf16>, vector<8x8xbf16>, vector<8x8xf32> -> vector<8x8xf32>
    %216 = tpu.reciprocal %213 {approx = true} : vector<8x1xf32> -> vector<8x1xf32>
    %217 = vector.broadcast %216 : vector<8x1xf32> to vector<8x8xf32>
    %218 = arith.mulf %215, %217 : vector<8x8xf32>
    %219 = arith.truncf %218 : vector<8x8xf32> to vector<8x8xbf16>
    %c0_94 = arith.constant 0 : index
    %c16_95 = arith.constant 16 : index
    %220 = vector.load %arg29[%c0_94, %c16_95] : memref<8x32xbf16, #tpu.memory_space<vmem>>, vector<8x8xbf16>
    tpu.vector_store %arg29[%c0_94, %c16_95], %219 {strides = array<i32>} : memref<8x32xbf16, #tpu.memory_space<vmem>>, vector<8x8xbf16>,
    %221 = vector.extract_strided_slice %153 {offsets = [0, 24], sizes = [8, 8], strides = [1, 1]} : vector<8x32xbf16> to vector<8x8xbf16>
    %222 = vector.extract_strided_slice %154 {offsets = [0, 24], sizes = [8, 8], strides = [1, 1]} : vector<8x32xbf16> to vector<8x8xbf16>
    %223 = vector.extract_strided_slice %155 {offsets = [0, 24], sizes = [8, 8], strides = [1, 1]} : vector<8x32xbf16> to vector<8x8xbf16>
    %cst_96 = arith.constant dense<0.000000e+00> : vector<8x8xf32>
    %224 = tpu.matmul %221, %222, %cst_96 {dimension_numbers = #tpu.dot_dimension_numbers<[1], [1], [0], [0], [0, 0, 1, 0], [], []>} : vector<8x8xbf16>, vector<8x8xbf16>, vector<8x8xf32> -> vector<8x8xf32>
    %225 = arith.addf %224, %163 : vector<8x8xf32>
    %cst_97 = arith.constant dense<0xFF800000> : vector<8xf32>
    %226 = vector.multi_reduction <maximumf>, %225, %cst_97 [1] : vector<8x8xf32> to vector<8xf32>
    %227 = vector.shape_cast %226 : vector<8xf32> to vector<8x1xf32>
    %228 = vector.broadcast %227 : vector<8x1xf32> to vector<8x8xf32>
    %229 = arith.subf %225, %228 : vector<8x8xf32>
    %230 = math.exp %229 : vector<8x8xf32>
    %cst_98 = arith.constant dense<0.000000e+00> : vector<8xf32>
    %231 = vector.multi_reduction <add>, %230, %cst_98 [1] : vector<8x8xf32> to vector<8xf32>
    %232 = vector.shape_cast %231 : vector<8xf32> to vector<8x1xf32>
    %233 = arith.truncf %230 : vector<8x8xf32> to vector<8x8xbf16>
    %cst_99 = arith.constant dense<0.000000e+00> : vector<8x8xf32>
    %234 = tpu.matmul %233, %223, %cst_99 {dimension_numbers = #tpu.dot_dimension_numbers<[1], [0], [0], [1], [0, 0, 1, 1], [], []>} : vector<8x8xbf16>, vector<8x8xbf16>, vector<8x8xf32> -> vector<8x8xf32>
    %235 = tpu.reciprocal %232 {approx = true} : vector<8x1xf32> -> vector<8x1xf32>
    %236 = vector.broadcast %235 : vector<8x1xf32> to vector<8x8xf32>
    %237 = arith.mulf %234, %236 : vector<8x8xf32>
    %238 = arith.truncf %237 : vector<8x8xf32> to vector<8x8xbf16>
    %c0_100 = arith.constant 0 : index
    %c24_101 = arith.constant 24 : index
    %239 = vector.load %arg29[%c0_100, %c24_101] : memref<8x32xbf16, #tpu.memory_space<vmem>>, vector<8x8xbf16>
    tpu.vector_store %arg29[%c0_100, %c24_101], %238 {strides = array<i32>} : memref<8x32xbf16, #tpu.memory_space<vmem>>, vector<8x8xbf16>,
    %c0_102 = arith.constant 0 : index
    %c0_103 = arith.constant 0 : index
    %240 = vector.load %arg29[%c0_102, %c0_103] : memref<8x32xbf16, #tpu.memory_space<vmem>>, vector<8x32xbf16>
    %c0_104 = arith.constant 0 : index
    %c0_105 = arith.constant 0 : index
    %241 = vector.load %arg16[%c0_104, %c0_105] : memref<32x32xbf16, #tpu.memory_space<vmem>>, vector<32x32xbf16>
    %cst_106 = arith.constant dense<0.000000e+00> : vector<8x32xf32>
    %242 = tpu.matmul %240, %241, %cst_106 {dimension_numbers = #tpu.dot_dimension_numbers<[1], [0], [0], [1], [0, 0, 1, 1], [], []>} : vector<8x32xbf16>, vector<32x32xbf16>, vector<8x32xf32> -> vector<8x32xf32>
    %c0_107 = arith.constant 0 : index
    %c0_108 = arith.constant 0 : index
    %243 = vector.load %arg17[%c0_107, %c0_108] : memref<1x32xf32, #tpu.memory_space<vmem>>, vector<1x32xf32>
    %244 = vector.broadcast %243 : vector<1x32xf32> to vector<8x32xf32>
    %245 = arith.addf %242, %244 : vector<8x32xf32>
    %246 = arith.addf %132, %245 : vector<8x32xf32>
    %c0_109 = arith.constant 0 : index
    %c0_110 = arith.constant 0 : index
    %247 = vector.load %arg20[%c0_109, %c0_110] : memref<1x32xf32, #tpu.memory_space<vmem>>, vector<1x32xf32>
    %c0_111 = arith.constant 0 : index
    %c0_112 = arith.constant 0 : index
    %248 = vector.load %arg21[%c0_111, %c0_112] : memref<1x32xf32, #tpu.memory_space<vmem>>, vector<1x32xf32>
    %cst_113 = arith.constant dense<0.000000e+00> : vector<8xf32>
    %249 = vector.multi_reduction <add>, %246, %cst_113 [1] : vector<8x32xf32> to vector<8xf32>
    %250 = vector.shape_cast %249 : vector<8xf32> to vector<8x1xf32>
    %cst_114 = arith.constant 3.200000e+01 : f32
    %251 = vector.broadcast %cst_114 : f32 to vector<8x1xf32>
    %252 = arith.divf %250, %251 : vector<8x1xf32>
    %253 = vector.broadcast %252 : vector<8x1xf32> to vector<8x32xf32>
    %254 = arith.subf %246, %253 : vector<8x32xf32>
    %255 = arith.mulf %254, %254 : vector<8x32xf32>
    %cst_115 = arith.constant dense<0.000000e+00> : vector<8xf32>
    %256 = vector.multi_reduction <add>, %255, %cst_115 [1] : vector<8x32xf32> to vector<8xf32>
    %257 = vector.shape_cast %256 : vector<8xf32> to vector<8x1xf32>
    %cst_116 = arith.constant 3.200000e+01 : f32
    %258 = vector.broadcast %cst_116 : f32 to vector<8x1xf32>
    %259 = arith.divf %257, %258 : vector<8x1xf32>
    %cst_117 = arith.constant 9.99999996E-13 : f32
    %260 = vector.broadcast %cst_117 : f32 to vector<8x1xf32>
    %261 = arith.addf %259, %260 : vector<8x1xf32>
    %262 = math.rsqrt %261 : vector<8x1xf32>
    %263 = vector.broadcast %262 : vector<8x1xf32> to vector<8x32xf32>
    %264 = arith.mulf %254, %263 : vector<8x32xf32>
    %265 = vector.broadcast %247 : vector<1x32xf32> to vector<8x32xf32>
    %266 = arith.mulf %264, %265 : vector<8x32xf32>
    %267 = vector.broadcast %248 : vector<1x32xf32> to vector<8x32xf32>
    %268 = arith.addf %266, %267 : vector<8x32xf32>
    %269 = arith.truncf %268 : vector<8x32xf32> to vector<8x32xbf16>
    %cst_118 = arith.constant 0.000000e+00 : f32
    %270 = vector.broadcast %cst_118 : f32 to vector<8x32xf32>
    %c0_119 = arith.constant 0 : index
    %c0_120 = arith.constant 0 : index
    %271 = vector.load %arg24[%c0_119, %c0_120] : memref<32x64xbf16, #tpu.memory_space<vmem>>, vector<32x64xbf16>
    %cst_121 = arith.constant dense<0.000000e+00> : vector<8x64xf32>
    %272 = tpu.matmul %269, %271, %cst_121 {dimension_numbers = #tpu.dot_dimension_numbers<[1], [0], [0], [1], [0, 0, 1, 1], [], []>} : vector<8x32xbf16>, vector<32x64xbf16>, vector<8x64xf32> -> vector<8x64xf32>
    %c0_122 = arith.constant 0 : index
    %c0_123 = arith.constant 0 : index
    %273 = vector.load %arg25[%c0_122, %c0_123] : memref<1x64xf32, #tpu.memory_space<vmem>>, vector<1x64xf32>
    %274 = vector.broadcast %273 : vector<1x64xf32> to vector<8x64xf32>
    %275 = arith.addf %272, %274 : vector<8x64xf32>
    %cst_124 = arith.constant 0.000000e+00 : f32
    %276 = vector.broadcast %cst_124 : f32 to vector<8x64xf32>
    %277 = arith.maximumf %275, %276 : vector<8x64xf32>
    %278 = arith.truncf %277 : vector<8x64xf32> to vector<8x64xbf16>
    %c0_125 = arith.constant 0 : index
    %c0_126 = arith.constant 0 : index
    %279 = vector.load %arg26[%c0_125, %c0_126] : memref<64x32xbf16, #tpu.memory_space<vmem>>, vector<64x32xbf16>
    %cst_127 = arith.constant dense<0.000000e+00> : vector<8x32xf32>
    %280 = tpu.matmul %278, %279, %cst_127 {dimension_numbers = #tpu.dot_dimension_numbers<[1], [0], [0], [1], [0, 0, 1, 1], [], []>} : vector<8x64xbf16>, vector<64x32xbf16>, vector<8x32xf32> -> vector<8x32xf32>
    %281 = arith.addf %270, %280 : vector<8x32xf32>
    %c0_128 = arith.constant 0 : index
    %c0_129 = arith.constant 0 : index
    %282 = vector.load %arg27[%c0_128, %c0_129] : memref<1x32xf32, #tpu.memory_space<vmem>>, vector<1x32xf32>
    %283 = vector.broadcast %282 : vector<1x32xf32> to vector<8x32xf32>
    %284 = arith.addf %281, %283 : vector<8x32xf32>
    %285 = arith.addf %268, %284 : vector<8x32xf32>
    %c0_130 = arith.constant 0 : index
    %c0_131 = arith.constant 0 : index
    %286 = vector.load %arg22[%c0_130, %c0_131] : memref<1x32xf32, #tpu.memory_space<vmem>>, vector<1x32xf32>
    %c0_132 = arith.constant 0 : index
    %c0_133 = arith.constant 0 : index
    %287 = vector.load %arg23[%c0_132, %c0_133] : memref<1x32xf32, #tpu.memory_space<vmem>>, vector<1x32xf32>
    %cst_134 = arith.constant dense<0.000000e+00> : vector<8xf32>
    %288 = vector.multi_reduction <add>, %285, %cst_134 [1] : vector<8x32xf32> to vector<8xf32>
    %289 = vector.shape_cast %288 : vector<8xf32> to vector<8x1xf32>
    %cst_135 = arith.constant 3.200000e+01 : f32
    %290 = vector.broadcast %cst_135 : f32 to vector<8x1xf32>
    %291 = arith.divf %289, %290 : vector<8x1xf32>
    %292 = vector.broadcast %291 : vector<8x1xf32> to vector<8x32xf32>
    %293 = arith.subf %285, %292 : vector<8x32xf32>
    %294 = arith.mulf %293, %293 : vector<8x32xf32>
    %cst_136 = arith.constant dense<0.000000e+00> : vector<8xf32>
    %295 = vector.multi_reduction <add>, %294, %cst_136 [1] : vector<8x32xf32> to vector<8xf32>
    %296 = vector.shape_cast %295 : vector<8xf32> to vector<8x1xf32>
    %cst_137 = arith.constant 3.200000e+01 : f32
    %297 = vector.broadcast %cst_137 : f32 to vector<8x1xf32>
    %298 = arith.divf %296, %297 : vector<8x1xf32>
    %cst_138 = arith.constant 9.99999996E-13 : f32
    %299 = vector.broadcast %cst_138 : f32 to vector<8x1xf32>
    %300 = arith.addf %298, %299 : vector<8x1xf32>
    %301 = math.rsqrt %300 : vector<8x1xf32>
    %302 = vector.broadcast %301 : vector<8x1xf32> to vector<8x32xf32>
    %303 = arith.mulf %293, %302 : vector<8x32xf32>
    %304 = vector.broadcast %286 : vector<1x32xf32> to vector<8x32xf32>
    %305 = arith.mulf %303, %304 : vector<8x32xf32>
    %306 = vector.broadcast %287 : vector<1x32xf32> to vector<8x32xf32>
    %307 = arith.addf %305, %306 : vector<8x32xf32>
    %308 = vector.shape_cast %307 : vector<8x32xf32> to vector<1x8x32xf32>
    %c0_139 = arith.constant 0 : index
    %c0_140 = arith.constant 0 : index
    %c0_141 = arith.constant 0 : index
    %309 = vector.load %arg28[%c0_139, %c0_140, %c0_141] : memref<1x8x32xf32, #tpu.memory_space<vmem>>, vector<1x8x32xf32>
    tpu.vector_store %arg28[%c0_139, %c0_140, %c0_141], %308 {strides = array<i32>} : memref<1x8x32xf32, #tpu.memory_space<vmem>>, vector<1x8x32xf32>,
    return
  }
  func.func @transform_0(%arg0: i32) -> (i32, i32, i32) {
    %c0_i32 = arith.constant 0 : i32
    %c0_i32_0 = arith.constant 0 : i32
    %c0_i32_1 = arith.constant 0 : i32
    return %arg0, %c0_i32, %c0_i32_0 : i32, i32, i32
  }
  func.func @transform_1(%arg0: i32) -> (i32, i32, i32) {
    %c0_i32 = arith.constant 0 : i32
    %c0_i32_0 = arith.constant 0 : i32
    %c0_i32_1 = arith.constant 0 : i32
    return %arg0, %c0_i32, %c0_i32_0 : i32, i32, i32
  }
  func.func @transform_2(%arg0: i32) -> (i32, i32, i32) {
    %c0_i32 = arith.constant 0 : i32
    %c0_i32_0 = arith.constant 0 : i32
    %c0_i32_1 = arith.constant 0 : i32
    return %arg0, %c0_i32, %c0_i32_0 : i32, i32, i32
  }
  func.func @transform_3(%arg0: i32) -> (i32, i32, i32) {
    %c0_i32 = arith.constant 0 : i32
    %c0_i32_0 = arith.constant 0 : i32
    %c0_i32_1 = arith.constant 0 : i32
    return %arg0, %c0_i32, %c0_i32_0 : i32, i32, i32
  }
  func.func @transform_4(%arg0: i32) -> (i32, i32, i32) {
    %c0_i32 = arith.constant 0 : i32
    %c0_i32_0 = arith.constant 0 : i32
    %c0_i32_1 = arith.constant 0 : i32
    return %arg0, %c0_i32, %c0_i32_0 : i32, i32, i32
  }
  func.func @transform_5(%arg0: i32) -> (i32, i32) {
    %c0_i32 = arith.constant 0 : i32
    %c0_i32_0 = arith.constant 0 : i32
    %c0_i32_1 = arith.constant 0 : i32
    return %c0_i32, %c0_i32_0 : i32, i32
  }
  func.func @transform_6(%arg0: i32) -> (i32, i32) {
    %c0_i32 = arith.constant 0 : i32
    %c0_i32_0 = arith.constant 0 : i32
    %c0_i32_1 = arith.constant 0 : i32
    return %c0_i32, %c0_i32_0 : i32, i32
  }
  func.func @transform_7(%arg0: i32) -> (i32, i32) {
    %c0_i32 = arith.constant 0 : i32
    %c0_i32_0 = arith.constant 0 : i32
    %c0_i32_1 = arith.constant 0 : i32
    return %c0_i32, %c0_i32_0 : i32, i32
  }
  func.func @transform_8(%arg0: i32) -> (i32, i32) {
    %c0_i32 = arith.constant 0 : i32
    %c0_i32_0 = arith.constant 0 : i32
    %c0_i32_1 = arith.constant 0 : i32
    return %c0_i32, %c0_i32_0 : i32, i32
  }
  func.func @transform_9(%arg0: i32) -> (i32, i32) {
    %c0_i32 = arith.constant 0 : i32
    %c0_i32_0 = arith.constant 0 : i32
    %c0_i32_1 = arith.constant 0 : i32
    return %c0_i32, %c0_i32_0 : i32, i32
  }
  func.func @transform_10(%arg0: i32) -> (i32, i32) {
    %c0_i32 = arith.constant 0 : i32
    %c0_i32_0 = arith.constant 0 : i32
    %c0_i32_1 = arith.constant 0 : i32
    return %c0_i32, %c0_i32_0 : i32, i32
  }
  func.func @transform_11(%arg0: i32) -> (i32, i32) {
    %c0_i32 = arith.constant 0 : i32
    %c0_i32_0 = arith.constant 0 : i32
    %c0_i32_1 = arith.constant 0 : i32
    return %c0_i32, %c0_i32_0 : i32, i32
  }
  func.func @transform_12(%arg0: i32) -> (i32, i32) {
    %c0_i32 = arith.constant 0 : i32
    %c0_i32_0 = arith.constant 0 : i32
    %c0_i32_1 = arith.constant 0 : i32
    return %c0_i32, %c0_i32_0 : i32, i32
  }
  func.func @transform_13(%arg0: i32) -> (i32, i32) {
    %c0_i32 = arith.constant 0 : i32
    %c0_i32_0 = arith.constant 0 : i32
    %c0_i32_1 = arith.constant 0 : i32
    return %c0_i32, %c0_i32_0 : i32, i32
  }
  func.func @transform_14(%arg0: i32) -> (i32, i32) {
    %c0_i32 = arith.constant 0 : i32
    %c0_i32_0 = arith.constant 0 : i32
    %c0_i32_1 = arith.constant 0 : i32
    return %c0_i32, %c0_i32_0 : i32, i32
  }
  func.func @transform_15(%arg0: i32) -> (i32, i32) {
    %c0_i32 = arith.constant 0 : i32
    %c0_i32_0 = arith.constant 0 : i32
    %c0_i32_1 = arith.constant 0 : i32
    return %c0_i32, %c0_i32_0 : i32, i32
  }
  func.func @transform_16(%arg0: i32) -> (i32, i32) {
    %c0_i32 = arith.constant 0 : i32
    %c0_i32_0 = arith.constant 0 : i32
    %c0_i32_1 = arith.constant 0 : i32
    return %c0_i32, %c0_i32_0 : i32, i32
  }
  func.func @transform_17(%arg0: i32) -> (i32, i32) {
    %c0_i32 = arith.constant 0 : i32
    %c0_i32_0 = arith.constant 0 : i32
    %c0_i32_1 = arith.constant 0 : i32
    return %c0_i32, %c0_i32_0 : i32, i32
  }
  func.func @transform_18(%arg0: i32) -> (i32, i32) {
    %c0_i32 = arith.constant 0 : i32
    %c0_i32_0 = arith.constant 0 : i32
    %c0_i32_1 = arith.constant 0 : i32
    return %c0_i32, %c0_i32_0 : i32, i32
  }
  func.func @transform_19(%arg0: i32) -> (i32, i32) {
    %c0_i32 = arith.constant 0 : i32
    %c0_i32_0 = arith.constant 0 : i32
    %c0_i32_1 = arith.constant 0 : i32
    return %c0_i32, %c0_i32_0 : i32, i32
  }
  func.func @transform_20(%arg0: i32) -> (i32, i32) {
    %c0_i32 = arith.constant 0 : i32
    %c0_i32_0 = arith.constant 0 : i32
    %c0_i32_1 = arith.constant 0 : i32
    return %c0_i32, %c0_i32_0 : i32, i32
  }
  func.func @transform_21(%arg0: i32) -> (i32, i32) {
    %c0_i32 = arith.constant 0 : i32
    %c0_i32_0 = arith.constant 0 : i32
    %c0_i32_1 = arith.constant 0 : i32
    return %c0_i32, %c0_i32_0 : i32, i32
  }
  func.func @transform_22(%arg0: i32) -> (i32, i32) {
    %c0_i32 = arith.constant 0 : i32
    %c0_i32_0 = arith.constant 0 : i32
    %c0_i32_1 = arith.constant 0 : i32
    return %c0_i32, %c0_i32_0 : i32, i32
  }
  func.func @transform_23(%arg0: i32) -> (i32, i32) {
    %c0_i32 = arith.constant 0 : i32
    %c0_i32_0 = arith.constant 0 : i32
    %c0_i32_1 = arith.constant 0 : i32
    return %c0_i32, %c0_i32_0 : i32, i32
  }
  func.func @transform_24(%arg0: i32) -> (i32, i32) {
    %c0_i32 = arith.constant 0 : i32
    %c0_i32_0 = arith.constant 0 : i32
    %c0_i32_1 = arith.constant 0 : i32
    return %c0_i32, %c0_i32_0 : i32, i32
  }
  func.func @transform_25(%arg0: i32) -> (i32, i32) {
    %c0_i32 = arith.constant 0 : i32
    %c0_i32_0 = arith.constant 0 : i32
    %c0_i32_1 = arith.constant 0 : i32
    return %c0_i32, %c0_i32_0 : i32, i32
  }
  func.func @transform_26(%arg0: i32) -> (i32, i32) {
    %c0_i32 = arith.constant 0 : i32
    %c0_i32_0 = arith.constant 0 : i32
    %c0_i32_1 = arith.constant 0 : i32
    return %c0_i32, %c0_i32_0 : i32, i32
  }
  func.func @transform_27(%arg0: i32) -> (i32, i32, i32) {
    %c0_i32 = arith.constant 0 : i32
    %c0_i32_0 = arith.constant 0 : i32
    %c0_i32_1 = arith.constant 0 : i32
    return %arg0, %c0_i32, %c0_i32_0 : i32, i32, i32
  }
}

</mosaic_0001>

<bundles_post_ra>
// kernel: tpu_custom_call.1
= control target key start
LH: loop header
LB: loop body
LE: loop exit
PB: predicated region body
PF: predicated region fallthrough
CT: control target
= control target key end

     0   :  { %s3924_s0 = inlined_call_operand.vmem [shape: f32[2,8,32], index: 0, kind: input, shape index: {}]   ;;  %s3925_s1 = inlined_call_operand.vmem [shape: f32[2,8,32], index: 1, kind: input, shape index: {}]   ;;  %s3926_s2 = inlined_call_operand.vmem [shape: f32[2,8,32], index: 2, kind: input, shape index: {}]   ;;  %s3927_s3 = inlined_call_operand.hbm [shape: s8[2,8,8], index: 3, kind: input, shape index: {}]   ;;  %s3928_s4 = inlined_call_operand.hbm [shape: s8[2,8,8], index: 4, kind: input, shape index: {}]   ;;  %s3929_s5 = inlined_call_operand.hbm [shape: bf16[32,96], index: 5, kind: input, shape index: {}]   ;;  %s3930_s6 = inlined_call_operand.hbm [shape: f32[1,96], index: 6, kind: input, shape index: {}]   ;;  %s3931_s7 = inlined_call_operand.hbm [shape: bf16[32,32], index: 7, kind: input, shape index: {}]   ;;  %s3932_s8 = inlined_call_operand.hbm [shape: f32[1,32], index: 8, kind: input, shape index: {}]   ;;  %s3933_s9 = inlined_call_operand.hbm [shape: bf16[32,32], index: 9, kind: input, shape index: {}]   ;;  %s3934_s10 = inlined_call_operand.hbm [shape: f32[1,32], index: 10, kind: input, shape index: {}]   ;;  %s3935_s11 = inlined_call_operand.hbm [shape: bf16[32,32], index: 11, kind: input, shape index: {}]   ;;  %s3936_s12 = inlined_call_operand.hbm [shape: f32[1,32], index: 12, kind: input, shape index: {}]   ;;  %s3937_s13 = inlined_call_operand.hbm [shape: bf16[32,32], index: 13, kind: input, shape index: {}]   ;;  %s3938_s14 = inlined_call_operand.hbm [shape: f32[1,32], index: 14, kind: input, shape index: {}]   ;;  %s3939_s15 = inlined_call_operand.hbm [shape: bf16[32,32], index: 15, kind: input, shape index: {}]   ;;  %s3940_s16 = inlined_call_operand.hbm [shape: f32[1,32], index: 16, kind: input, shape index: {}]   ;;  %s3941_s17 = inlined_call_operand.hbm [shape: f32[1,32], index: 17, kind: input, shape index: {}]   ;;  %s3942_s18 = inlined_call_operand.vmem [shape: f32[1,32], index: 18, kind: input, shape index: {}]   ;;  %s3943_s19 = inlined_call_operand.vmem [shape: f32[1,32], index: 19, kind: input, shape index: {}]   ;;  %s3944_s20 = inlined_call_operand.vmem [shape: f32[1,32], index: 20, kind: input, shape index: {}]   ;;  %s3945_s21 = inlined_call_operand.vmem [shape: f32[1,32], index: 21, kind: input, shape index: {}]   ;;  %s3946_s22 = inlined_call_operand.vmem [shape: f32[1,32], index: 22, kind: input, shape index: {}]   ;;  %s3947_s23 = inlined_call_operand.vmem [shape: bf16[32,64], index: 23, kind: input, shape index: {}]   ;;  %s3948_s24 = inlined_call_operand.vmem [shape: f32[1,64], index: 24, kind: input, shape index: {}]   ;;  %s3949_s25 = inlined_call_operand.vmem [shape: bf16[64,32], index: 25, kind: input, shape index: {}]   ;;  %s3950_s26 = inlined_call_operand.vmem [shape: f32[1,32], index: 26, kind: input, shape index: {}]   ;;  %s3951_s27 = inlined_call_operand.hbm [shape: f32[2,8,32], index: 27, kind: output, shape index: {}]  }
   0x1   :  { %3957 = sst [smem:[#allocation39_spill]] %s3924_s0 }
   0x2   :  { %3958 = sst [smem:[#allocation40_spill]] %s3925_s1 }
   0x3   :  { %3959 = sst [smem:[#allocation41_spill]] %s3926_s2 }
   0x4   :  { %3960 = sst [smem:[#allocation42_spill]] %s3927_s3 }
   0x5   :  { %3961 = sst [smem:[#allocation43_spill]] %s3928_s4 }
   0x6   :  { %3962 = sst [smem:[#allocation44_spill]] %s3929_s5 }
   0x7   :  { %3963 = sst [smem:[#allocation45_spill]] %s3930_s6 }
   0x8   :  { %3964 = sst [smem:[#allocation46_spill]] %s3931_s7 }
   0x9   :  { %3965 = sst [smem:[#allocation47_spill]] %s3932_s8 }
   0xa   :  { %3966 = sst [smem:[#allocation48_spill]] %s3933_s9 }
   0xb   :  { %3967 = sst [smem:[#allocation49_spill]] %s3934_s10 }
   0xc   :  { %3968 = sst [smem:[#allocation50_spill]] %s3935_s11 }
   0xd   :  { %3969 = sst [smem:[#allocation51_spill]] %s3936_s12 }
   0xe   :  { %3970 = sst [smem:[#allocation52_spill]] %s3937_s13 }
   0xf   :  { %3971 = sst [smem:[#allocation53_spill]] %s3938_s14 }
  0x10   :  { %3972 = sst [smem:[#allocation54_spill]] %s3939_s15 }
  0x11   :  { %3973 = sst [smem:[#allocation55_spill]] %s3940_s16 }
  0x12   :  { %3974 = sst [smem:[#allocation56_spill]] %s3941_s17 }
  0x13   :  { %3975 = sst [smem:[#allocation57_spill]] %s3943_s19 }
  0x14   :  { %3976 = sst [smem:[#allocation58_spill]] %s3944_s20 }
  0x15   :  { %3977 = sst [smem:[#allocation59_spill]] %s3945_s21 }
  0x16   :  { %3978 = sst [smem:[#allocation60_spill]] %s3946_s22 }
  0x17   :  { %3979 = sst [smem:[#allocation61_spill]] %s3947_s23 }
  0x18   :  { %3980 = sst [smem:[#allocation62_spill]] %s3948_s24 }
  0x19   :  { %3981 = sst [smem:[#allocation63_spill]] %s3949_s25 }
  0x1a   :  { %3982 = sst [smem:[#allocation64_spill]] %s3950_s26 }
  0x1b   :  { %3983 = sst [smem:[#allocation65_spill]] %s3951_s27 }
  0x1c   :  { %32 = vsyncpa [#allocation4], 0 }
  0x1d   :  { %34 = vsyncpa [#allocation4 + $0x1], 0 }
  0x1e   :  { %35 = vsyncpa [#allocation7], 0 }
  0x1f   :  { %37 = vsyncpa [#allocation7 + $0x1], 0 }
  0x20   :  { %38 = vsyncpa [#allocation10], 0 }
  0x21   :  { %39 = vsyncpa [#allocation13], 0 }
  0x22   :  { %40 = vsyncpa [#allocation16], 0 }
  0x23   :  { %41 = vsyncpa [#allocation19], 0 }
  0x24   :  { %42 = vsyncpa [#allocation22], 0 }
  0x25   :  { %43 = vsyncpa [#allocation25], 0 }
  0x26   :  { %44 = vsyncpa [#allocation5], 0 }
  0x27   :  { %46 = vsyncpa [#allocation5 + $0x1], 0  ;;  %s3471_s7 = smov 0   ;;  %s3473_s4 = smov 0  }
  0x28   :  { %s3475_s8 = smov 0   ;;  %s3477_s30 = smov 0  }
  0x29 LB: > { %s3984_s28 = sld [smem:[#allocation44_spill]]  ;;  %s3495_s10 = sadd.s32 4294967295, %s3298_s30   ;;  %s3298_s30 = sphi %s3477_s30, %s4024_s30   ;;  %s3294_s8 = sphi %s3475_s8, %s4023_s8   ;;  %s3290_s4 = sphi %s3473_s4, %s4022_s4   ;;  %s3286_s7 = sphi %s3471_s7, %s4021_s7  }
  0x2a   : > { %p2339_p0 = scmp.ge.s32.totalorder %s3298_s30, 1  ;;  %p151_p1 = scmp.eq.s32.totalorder %s3495_s10, 0 }
  0x2b   : > { %p675_p2 = scmp.lt.s32.totalorder %s3298_s30, 3  ;;  %s3300_s1 = smov [#allocation8]  }
  0x2c   : > { %s688_s6 = sshll.u32 %s3300_s1, 4  ;;  %s3986_s3 = sld [smem:[#allocation45_spill]]  ;;  %s689_s6 = int_to_ptr.vmem [resolvable:$true] %s688_s6 }
  0x2d   : > { %p3500_p3 = pnand %p2339_p0, %p675_p2  ;;  %s3988_s1 = sld [smem:[#allocation47_spill]] }
  0x2e   : > { %s3301_s21 = smov [#allocation9]   ;;  %s3302_s24 = smov 64  }
  0x2f   : > { %s686_s0 = sshll.u32 %s3984_s28, 4  ;;  %p2554_p4 = pneg %p3500_p3  ;;  %s687_s0 = int_to_ptr.hbm [resolvable:$true] %s686_s0 }
  0x30   : > { %s703_s26 = sshll.u32 %s3301_s21, 4  ;;  %s3303_s20 = smov 4   ;;  %s704_s26 = int_to_ptr.vmem [resolvable:$true] %s703_s26 }
  0x31   : > { %p3512_p6 = pnand %p2554_p4, %p151_p1  ;;  %s3304_s22 = smov [#allocation12]  }
  0x32   : > { %s701_s9 = sshll.u32 %s3986_s3, 4  ;;  %s3989_s3 = sld [smem:[#allocation49_spill]]  ;;  %s702_s9 = int_to_ptr.hbm [resolvable:$true] %s701_s9 }
  0x33   : > { %s727_s27 = sshll.u32 %s3988_s1, 4  ;;  %s729_s28 = sshll.u32 %s3304_s22, 4  ;;  %s728_s27 = int_to_ptr.hbm [resolvable:$true] %s727_s27  ;;  %s730_s28 = int_to_ptr.vmem [resolvable:$true] %s729_s28 }
  0x34   : > { %2557 = dma.hbm_to_vmem [thread:$0]  (!%p3512_p6), %s687_s0, 256, %s689_s6, [#allocation7], %s3302_s24, %s3302_s24, %s3303_s20  }
  0x35   : > { %2560 = dma.hbm_to_vmem [thread:$0]  (!%p3512_p6), %s702_s9, 16, %s704_s26, [#allocation10]  }
  0x36   : > { %2566 = dma.hbm_to_vmem [thread:$0]  (!%p3512_p6), %s728_s27, 16, %s730_s28, [#allocation13]  }
  0x37   : > { %s3305_s21 = smov [#allocation15]   ;;  %s3990_s12 = sld [smem:[#allocation51_spill]] }
  0x38   : > { %s753_s19 = sshll.u32 %s3989_s3, 4  ;;  %s755_s1 = sshll.u32 %s3305_s21, 4  ;;  %s754_s19 = int_to_ptr.hbm [resolvable:$true] %s753_s19  ;;  %s756_s1 = int_to_ptr.vmem [resolvable:$true] %s755_s1 }
  0x39   : > { %2572 = dma.hbm_to_vmem [thread:$0]  (!%p3512_p6), %s754_s19, 16, %s756_s1, [#allocation16]  }
  0x3a   : > { %s3991_s14 = sld [smem:[#allocation53_spill]]  ;;  %s3306_s11 = smov [#allocation18]  }
  0x3b   : > { %s781_s2 = sshll.u32 %s3306_s11, 4  ;;  %s3307_s27 = smov [#allocation21]   ;;  %s782_s2 = int_to_ptr.vmem [resolvable:$true] %s781_s2 }
  0x3c   : > { %s807_s3 = sshll.u32 %s3307_s27, 4  ;;  %s3992_s16 = sld [smem:[#allocation55_spill]]  ;;  %s808_s3 = int_to_ptr.vmem [resolvable:$true] %s807_s3 }
  0x3d   : > { %s779_s0 = sshll.u32 %s3990_s12, 4  ;;  %s3993_s21 = sld [smem:[#allocation46_spill]]  ;;  %s780_s0 = int_to_ptr.hbm [resolvable:$true] %s779_s0 }
  0x3e   : > { %2578 = dma.hbm_to_vmem [thread:$0]  (!%p3512_p6), %s780_s0, 16, %s782_s2, [#allocation19]  }
  0x3f   : > { %s3308_s26 = smov [#allocation24]   ;;  %s3309_s0 = smov [#allocation11]  }
  0x40   : > { %s805_s9 = sshll.u32 %s3991_s14, 4  ;;  %s833_s6 = sshll.u32 %s3308_s26, 4  ;;  %s806_s9 = int_to_ptr.hbm [resolvable:$true] %s805_s9  ;;  %s834_s6 = int_to_ptr.vmem [resolvable:$true] %s833_s6 }
  0x41   : > { %2584 = dma.hbm_to_vmem [thread:$0]  (!%p3512_p6), %s806_s9, 16, %s808_s3, [#allocation22]  }
  0x42   : > { %s831_s22 = sshll.u32 %s3992_s16, 4  ;;  %s714_s11 = sshll.u32 %s3309_s0, 4  ;;  %s832_s22 = int_to_ptr.hbm [resolvable:$true] %s831_s22  ;;  %s715_s11 = int_to_ptr.vmem [resolvable:$true] %s714_s11 }
  0x43   : > { %s712_s1 = sshll.u32 %s3993_s21, 4  ;;  %s3994_s23 = sld [smem:[#allocation48_spill]]  ;;  %s713_s1 = int_to_ptr.hbm [resolvable:$true] %s712_s1 }
  0x44   : > { %2590 = dma.hbm_to_vmem [thread:$0]  (!%p3512_p6), %s832_s22, 16, %s834_s6, [#allocation25]  }
  0x45   : > { %2563 = dma.hbm_to_vmem [thread:$0]  (!%p3512_p6), %s713_s1, 256, %s715_s11, [#allocation10], %s3302_s24, %s3302_s24, %s3303_s20  }
  0x46   : > { %s3995_s19 = sld [smem:[#allocation50_spill]]  ;;  %s3310_s21 = smov [#allocation14]  }
  0x47   : > { %s740_s22 = sshll.u32 %s3310_s21, 4  ;;  %s3311_s26 = smov [#allocation17]   ;;  %s741_s22 = int_to_ptr.vmem [resolvable:$true] %s740_s22 }
  0x48   : > { %s766_s6 = sshll.u32 %s3311_s26, 4  ;;  %s3996_s13 = sld [smem:[#allocation52_spill]]  ;;  %s767_s6 = int_to_ptr.vmem [resolvable:$true] %s766_s6 }
  0x49   : > { %s738_s25 = sshll.u32 %s3994_s23, 4  ;;  %s3997_s15 = sld [smem:[#allocation54_spill]]  ;;  %s739_s25 = int_to_ptr.hbm [resolvable:$true] %s738_s25 }
  0x4a   : > { %2569 = dma.hbm_to_vmem [thread:$0]  (!%p3512_p6), %s739_s25, 256, %s741_s22, [#allocation13], %s3302_s24, %s3302_s24, %s3303_s20  }
  0x4b   : > { %s3312_s25 = smov [#allocation20]   ;;  %s3313_s3 = smov [#allocation23]  }
  0x4c   : > { %s764_s28 = sshll.u32 %s3995_s19, 4  ;;  %s792_s9 = sshll.u32 %s3312_s25, 4  ;;  %s765_s28 = int_to_ptr.hbm [resolvable:$true] %s764_s28  ;;  %s793_s9 = int_to_ptr.vmem [resolvable:$true] %s792_s9 }
  0x4d   : > { %2575 = dma.hbm_to_vmem [thread:$0]  (!%p3512_p6), %s765_s28, 256, %s767_s6, [#allocation16], %s3302_s24, %s3302_s24, %s3303_s20  }
  0x4e   : > { %s790_s1 = sshll.u32 %s3996_s13, 4  ;;  %s818_s19 = sshll.u32 %s3313_s3, 4  ;;  %s791_s1 = int_to_ptr.hbm [resolvable:$true] %s790_s1  ;;  %s819_s19 = int_to_ptr.vmem [resolvable:$true] %s818_s19 }
  0x4f   : > { %s816_s23 = sshll.u32 %s3997_s15, 4  ;;  %s3998_s17 = sld [smem:[#allocation56_spill]]  ;;  %s817_s23 = int_to_ptr.hbm [resolvable:$true] %s816_s23 }
  0x50   : > { %2581 = dma.hbm_to_vmem [thread:$0]  (!%p3512_p6), %s791_s1, 256, %s793_s9, [#allocation19], %s3302_s24, %s3302_s24, %s3303_s20  }
  0x51   : > { %2587 = dma.hbm_to_vmem [thread:$0]  (!%p3512_p6), %s817_s23, 256, %s819_s19, [#allocation22], %s3302_s24, %s3302_s24, %s3303_s20  }
  0x52   : > { %s3314_s26 = smov [#allocation26]   ;;  %s2338_s0 = sadd.s32 4294967294, %s3298_s30  }
  0x53   : > { %s845_s6 = sshll.u32 %s3314_s26, 4  ;;  %s3595_s2 = sadd.s32 1, %s3298_s30   ;;  %s846_s6 = int_to_ptr.vmem [resolvable:$true] %s845_s6 }
  0x54   : > { %s137_s1 = sadd.s32 1, %s3294_s8  ;;  %s134_s11 = ssub.s32 %s3298_s30, %s3595_s2 }
  0x55   : > { %s843_s22 = sshll.u32 %s3998_s17, 4  ;;  %p144_p7 = scmp.ne.s32.totalorder %s3294_s8, %s3290_s4  ;;  %s844_s22 = int_to_ptr.hbm [resolvable:$true] %s843_s22 }
  0x56   : > { %2593 = dma.hbm_to_vmem [thread:$0]  (!%p3512_p6), %s844_s22, 16, %s846_s6, [#allocation25]  }
  0x57   : > { %p135_p8 = scmp.eq.s32.totalorder %s134_s11, 0  ;;  %p145_p9 = scmp.eq.s32.totalorder %s3298_s30, 0 }
  0x58   : > { %p150_p10 = scmp.ne.s32.totalorder %s3290_s4, %s3286_s7  ;;  %p662_p11 = scmp.eq.s32.totalorder %s3495_s10, 1 }
  0x59   : > { %s3607_s20 = scalar_select %p135_p8, %s3294_s8, %s137_s1  }
  0x5a   : > { %p3609_p12 = por %p145_p9, %p144_p7  ;;  %p3615_p13 = por %p151_p1, %p150_p10 }
  0x5b   : > { %3999 = sst [smem:[#allocation38_spill]] %s3607_s20  ;;  %p3619_p0 = por %p662_p11, %p144_p7 }
  0x5c   : > { %p668_p2 = scmp.eq.s32.totalorder %s2338_s0, 1  ;;  %p2618_p4 = scmp.lt.s32.totalorder %s3298_s30, 2 }
  0x5d   : > { %s904_s23 = sand.u32 1, %s3294_s8   ;;  %s2355_s3 = sshll.u32 %s3298_s30, 1 }
  0x5e   : > { %p3625_p6 = por %p668_p2, %p150_p10  ;;  %s2354_s9 = sshll.u32 %s904_s23, 1 }
  0x5f   : > { %s4004_s21 = sld [smem:[#allocation42_spill]]  ;;  %s908_s6 = scalar_lea.vmem [#allocation3], %s2354_s9 }
  0x60   : > { %s916_s1 = sshll.u32 %s908_s6, 4  ;;  %p3635_p7 = pnand %p2618_p4, %p3609_p12  ;;  %s917_s1 = int_to_ptr.vmem [resolvable:$true] %s916_s1 }
  0x61   : > { %s4006_s13 = sld [smem:[#allocation43_spill]]  ;;  %s923_s15 = sand.u32 1, %s3298_s30  }
  0x62   : > { %s905_s16 = scalar_lea.sflag [#allocation4], %s904_s23  ;;  %p3144_p9 = pneg %p3635_p7 }
  0x65   : > { %s912_s22 = scalar_lea.hbm %s4004_s21, %s2355_s3  ;;  %s3147_s6 = scalar_lea.hbm %s4004_s21, 4 }
  0x66   : > { %s914_s26 = sshll.u32 %s912_s22, 4  ;;  %s915_s26 = int_to_ptr.hbm [resolvable:$true] %s914_s26 }
  0x67   : > { %s931_s14 = scalar_lea.hbm %s4006_s13, %s2355_s3  ;;  %s3140_s19 = sshra.s32 %s915_s26, 4  ;;  %s3141_s19 = int_to_ptr.hbm [resolvable:$true] %s3140_s19 }
  0x68   : > { %s3142_s28 = scalar_lea.hbm %s3141_s19, 2  ;;  %p3148_p12 = scmp.lt.s32.totalorder %s3141_s19, %s4004_s21 }
  0x69   : > { %p3143_p8 = scmp.ne.s32.totalorder %s3141_s19, %s3142_s28  ;;  %p3149_p2 = scmp.lt.s32.totalorder %s3147_s6, %s3142_s28 }
  0x6b   : > { %p3145_p10 = pnand %p3144_p9, %p3143_p8  ;;  %p3150_p4 = por %p3149_p2, %p3148_p12 }
  0x6d   : > { %p3146_p11 = pneg %p3145_p10 }
  0x6f   : > { %p3151_p5 = pnand %p3150_p4, %p3146_p11 }
  0x71   : > { %3154 = shalt.err (!%p3151_p5)
}
  0x72   : > { %2597 = dma.hbm_to_vmem [thread:$0]  (!%p3635_p7), %s915_s26, 32, %s917_s1, %s905_s16  }
  0x73   : > { %s933_s23 = sshll.u32 %s931_s14, 4  ;;  %s927_s3 = scalar_lea.vmem [#allocation6], %s2354_s9  ;;  %s934_s23 = int_to_ptr.hbm [resolvable:$true] %s933_s23 }
  0x74   : > { %s935_s17 = sshll.u32 %s927_s3, 4  ;;  %s924_s20 = scalar_lea.sflag [#allocation7], %s923_s15  ;;  %s936_s17 = int_to_ptr.vmem [resolvable:$true] %s935_s17 }
  0x75   : > { %s3170_s24 = sshra.s32 %s934_s23, 4  ;;  %s3177_s6 = scalar_lea.hbm %s4006_s13, 4  ;;  %s3171_s24 = int_to_ptr.hbm [resolvable:$true] %s3170_s24 }
  0x76   : > { %s3172_s22 = scalar_lea.hbm %s3171_s24, 2  ;;  %p3178_p5 = scmp.lt.s32.totalorder %s3171_s24, %s4006_s13 }
  0x77   : > { %p3173_p8 = scmp.ne.s32.totalorder %s3171_s24, %s3172_s22  ;;  %p3179_p11 = scmp.lt.s32.totalorder %s3177_s6, %s3172_s22 }
  0x79   : > { %p3175_p10 = pnand %p3173_p8, %p3144_p9  ;;  %p3180_p2 = por %p3179_p11, %p3178_p5 }
  0x7b   : > { %p3176_p12 = pneg %p3175_p10 }
  0x7d   : > { %p3181_p4 = pnand %p3180_p2, %p3176_p12 }
  0x7f   : > { %3184 = shalt.err (!%p3181_p4)
}
  0x80   : > { %2600 = dma.hbm_to_vmem [thread:$0]  (!%p3635_p7), %s934_s23, 32, %s936_s17, %s924_s20  }
  0x81   : > { %944 = sbr.rel (%p3500_p3) target bundleno = 3097 (0xc19), region = 128  ;;  %s3670_s14 = sand.u32 (!%p3500_p3), 1, %s3290_s4  }
  0x82   : > { %s2359_s15 = sshll.u32 (!%p3500_p3), %s3670_s14, 1  ;;  %s947_s9 = scalar_lea.sflag (!%p3500_p3), [#allocation4], %s3670_s14 }
  0x83   : > { %s3674_s26 = scalar_lea.vmem (!%p3500_p3), [#allocation3], %s2359_s15 }
  0x86   : > { %3245 = dma.done.wait (%p3615_p13), %s947_s9, 32  }
  0x87   : > { %3247 = vsyncadd (%p3615_p13), %s947_s9, 4294967264  ;;  %s956_s17 = sand.u32 1, %s3495_s10   ;;  %s3681_s20 = scalar_lea.vmem [#allocation6], %s2359_s15 }
  0x88   : > { %s957_s29 = scalar_lea.sflag [#allocation7], %s956_s17 }
  0x89   : > { %3249 = dma.done.wait (%p3615_p13), %s957_s29, 32  }
  0x8a   : > { %3251 = vsyncadd (%p3615_p13), %s957_s29, 4294967264 }
  0x8b   : > { %3253 = dma.done.wait (%p151_p1), [#allocation7], 256  }
  0x8c   : > { %3255 = vsyncadd (%p151_p1), [#allocation7], 4294967040 }
  0x8d   : > { %3257 = dma.done.wait (%p151_p1), [#allocation10], 272  }
  0x8e   : > { %3259 = vsyncadd (%p151_p1), [#allocation10], 4294967024 }
  0x8f   : > { %3261 = dma.done.wait (%p151_p1), [#allocation13], 272  }
  0x90   : > { %3263 = vsyncadd (%p151_p1), [#allocation13], 4294967024 }
  0x91   : > { %3265 = dma.done.wait (%p151_p1), [#allocation16], 272  }
  0x92   : > { %3267 = vsyncadd (%p151_p1), [#allocation16], 4294967024 }
  0x93   : > { %3269 = dma.done.wait (%p151_p1), [#allocation19], 272  }
  0x94   : > { %3271 = vsyncadd (%p151_p1), [#allocation19], 4294967024 }
  0x95   : > { %3273 = dma.done.wait (%p151_p1), [#allocation22], 272  }
  0x96   : > { %3275 = vsyncadd (%p151_p1), [#allocation22], 4294967024 }
  0x97   : > { %3277 = dma.done.wait (%p151_p1), [#allocation25], 32  }
  0x98   : > { %3279 = vsyncadd (%p151_p1), [#allocation25], 4294967264  ;;  %p1114_p3 = scmp.lt.s32.totalorder %s3495_s10, 1  ;;  %s4007_s23 = sld [smem:[#allocation39_spill]]  ;;  %v2479_v0 = vld [vmem:[#allocation8 + $0x8] sm:$0xff]  ;;  %v2478_v1 = vld [vmem:[#allocation8] sm:$0xff] }
  0x99   : > { %1161 = vmatpush.bf16.msra.mxu0 %v2479_v0  ;;  %vm1151_vm0 = vcmask 261120   ;;  %v2696_v4 = vld [vmem:[#allocation9] ss:$0 sm:$0xff]  ;;  %s3315_s24 = smov 96   ;;  %s3316_s22 = smov 104   ;;  %vm1181_vm1 = vcmask 64512  }
  0x9a   : > { %s1115_s5 = scalar_select %p1114_p3, %s3495_s10, 1  ;;  %vm1216_vm2 = vcmask 1043456   ;;  %v1171_v30 = vld [vmem:[%s3681_s20] sm:$0x3]  ;;  %v3324_v33 = vmov -1e+09  }
  0x9b   : > { %s3317_s19 = smov 120   ;;  %s3318_s28 = smov 88   ;;  %v1172_v31 = vunpack.c.0.s8 %v1171_v30  ;;  %vm1236_vm4 = vcmask 60416   ;;  %vm1302_vm5 = vcmask 126016   ;;  %vm1365_vm6 = vcmask 191616  }
  0x9c   : > { %s3717_s1 = sshll.u32 %s1115_s5, 3  ;;  %s3319_s6 = smov 80   ;;  %vm1428_vm7 = vcmask 257216  }
  0x9d   : > { %1162 = vmatpush.bf16.msra.mxu0 %v2478_v1  ;;  %s3320_s12 = smov 72   ;;  %s3321_s16 = smov 112   ;;  %v1173_v32 = vcvt.s32.f32 %v1172_v31 }
  0x9e   : > { %s1117_s3 = scalar_lea.vmem %s4007_s23, %s3717_s1  ;;  %s3322_s15 = smov 64  }
  0x9f   : > { %v3723_v2 = vld [vmem:[%s1117_s3] sm:$0xff]  ;;  %s3323_s9 = smov 56   ;;  %vm1174_vm3 = vcmp.gt.f32.partialorder %v1173_v32, 0.0  ;;  %s3325_s17 = smov 48  }
  0xa0   : > { %v1130_v3 = vpack.c.bf16 %v3723_v2, %v3723_v2  ;;  %v1175_v34 = vsel %vm1174_vm3, 0.0, %v3324_v33  ;;  %s3326_s29 = smov 40   ;;  %s3327_s20 = smov 8  }
  0xa1   : > { %s3328_s5 = smov 16   ;;  %s3329_s0 = smov 24  }
  0xa2   : > { %2386 = vmatmul.msk.bf16.vlgmr.msra.gmra.mxu0 %vm1151_vm0, %v1130_v3  ;;  %s4008_s3 = sld [smem:[#allocation40_spill]]  ;;  %s2374_s11 = sshll.u32 %s3670_s14, 3 }
  0xa3   : > { %s2475_s23 = sshll.u32 %s3495_s10, 3  ;;  %s1113_s10 = scalar_lea.vmem [#allocation27], %s2374_s11 }
 0x11f   : > { %v1164_v5 = vpop.f32.mrf.mxu0 }
 0x120   : > { %v1165_v6 = vadd.f32 %v2696_v4, %v1164_v5 }
 0x122   : > { %v1168_v7 = vmul.f32 0.35355338, %v1165_v6  ;;  %v1170_v8 = vpack.c.bf16 %v1165_v6, %v1165_v6 }
 0x124   : > { %v1169_v9 = vpack.c.bf16 %v1168_v7, %v1168_v7  ;;  %v1177_v10 = vunpack.c.l.b16 %v1170_v8 }
 0x126   : > { %v3728_v11 = vpack.c.b16 %v1177_v10, %v1177_v10  ;;  %v1239_v12 = vunpack.c.l.b16 %v1169_v9 }
 0x127   : > { %v1166_v13 = vpop.f32.mrf.mxu0 }
 0x128   : > { %1179 = vrot.lane.b32.xlu0 %v3728_v11, %s3315_s24  ;;  %v1240_v14 = vpack.c.b16 %v1239_v12, %v1239_v12  ;;  %s1121_s24 = scalar_lea.vmem %s4008_s3, %s3717_s1 }
 0x12a   : > { %1367 = vrot.lane.b32.xlu2 %v1240_v14, %s3316_s22  ;;  %1241 = vrot.lane.b32.xlu1 %v1240_v14, %s3317_s19 }
 0x130   : > { %1243 = vrot.lane.b32.xlu0 %v3728_v11, %s3318_s28  ;;  %s4016_s28 = sld [smem:[#allocation59_spill]] }
 0x132   : > { %1306 = vrot.lane.b32.xlu2 %v3728_v11, %s3319_s6  ;;  %1369 = vrot.lane.b32.xlu1 %v3728_v11, %s3320_s12  ;;  %s4013_s12 = sld [smem:[#allocation58_spill]] }
 0x138   : > { %1304 = vrot.lane.b32.xlu0 %v1240_v14, %s3321_s16 }
 0x13a   : > { %1211 = vrot.lane.b32.xlu2 %v3728_v11, %s3322_s15  ;;  %s4017_s15 = sld [smem:[#allocation65_spill]] }
 0x140   : > { %s3220_s11 = scalar_lea.hbm %s4017_s15, 16 }
 0x142   : > { %1274 = vrot.lane.b32.xlu2 %v3728_v11, %s3323_s9  ;;  %s4009_s9 = sld [smem:[#allocation41_spill]] }
 0x184   : > { %v1368_v15 = vpop.permute.xlu2 %1367 }
 0x18c   : > { %v1307_v16 = vpop.permute.xlu2 %1306 }
 0x18d   : > { %v1312_v17 = vsel %vm1181_vm1, %v1307_v16, 0 }
 0x18e   : > { %1321 = vmatpush.bf16.xpose.msrb.mxu0 %v1312_v17 }
 0x194   : > { %v1212_v18 = vpop.permute.xlu2 %1211 }
 0x195   : > { %v1218_v19 = vsel %vm1216_vm2, %v1212_v18, 0 }
 0x196   : > { %1227 = vmatpush.bf16.msra.mxu2 %v1218_v19 }
 0x19a   : > { %v1180_v20 = vpop.permute.xlu0 %1179 }
 0x19b   : > { %v1186_v21 = vsel %vm1181_vm1, %v1180_v20, 0 }
 0x19c   : > { %1195 = vmatpush.bf16.xpose.msra.mxu1 %v1186_v21  ;;  %v1275_v22 = vpop.permute.xlu2 %1274  ;;  %v1242_v23 = vpop.permute.xlu1 %1241 }
 0x19d   : > { %v1280_v24 = vsel %vm1216_vm2, %v1275_v22, 0 }
 0x19e   : > { %1289 = vmatpush.bf16.msrb.mxu2 %v1280_v24 }
 0x1a2   : > { %v1244_v25 = vpop.permute.xlu0 %1243 }
 0x1a3   : > { %2387 = vmatmul.msk.bf16.vlgmr.msra.gmra.mxu1 %vm1181_vm1, %v1169_v9  ;;  %v1249_v26 = vsel %vm1181_vm1, %v1244_v25, 0 }
 0x1a4   : > { %1258 = vmatpush.bf16.xpose.msra.mxu3 %v1249_v26  ;;  %v1370_v27 = vpop.permute.xlu1 %1369 }
 0x1a5   : > { %v1375_v28 = vsel %vm1181_vm1, %v1370_v27, 0 }
 0x1aa   : > { %v1305_v29 = vpop.permute.xlu0 %1304 }
 0x1ab   : > { %2389 = vmatmul.msk.bf16.vlgmr.msra.gmra.mxu3 %vm1181_vm1, %v1242_v23  ;;  %2391 = vmatmul.msk.bf16.vlgmr.msrb.gmra.mxu0 %vm1181_vm1, %v1305_v29 }
 0x1ac   : > { %1384 = vmatpush.bf16.xpose.msrb.mxu3 %v1375_v28 }
 0x1bb   : > { %2393 = vmatmul.msk.bf16.vlgmr.msrb.gmra.mxu3 %vm1181_vm1, %v1368_v15 }
 0x220   : > { %v1197_v35 = vpop.f32.mrf.mxu1 }
 0x221   : > { %v1198_v36 = vadd.f32 %v1197_v35, %v1175_v34 }
 0x223   : > { %v1201_v37 = vsel %vm1181_vm1, %v1198_v36, -inf }
 0x224   : > { %1202 = vmax.xlane.f32.xlu1 %v1201_v37 }
 0x228   : > { %v1199_v38 = vpop.f32.mrf.mxu1  ;;  %v1323_v39 = vpop.f32.mrf.mxu0 }
 0x229   : > { %v1324_v40 = vadd.f32 %v1323_v39, %v1175_v34 }
 0x22b   : > { %v1327_v41 = vsel %vm1181_vm1, %v1324_v40, -inf }
 0x22c   : > { %1328 = vmax.xlane.f32.xlu1 %v1327_v41  ;;  %v2481_v41 = vld [vmem:[#allocation11 + $0x8] sm:$0xff] }
 0x22d   : > { %1460 = vmatpush.bf16.msra.mxu0 %v2481_v41 }
 0x22e   : > { %v1260_v42 = vpop.f32.mrf.mxu3 }
 0x22f   : > { %v1261_v43 = vadd.f32 %v1260_v42, %v1175_v34  ;;  %v2480_v42 = vld [vmem:[#allocation11] sm:$0xff] }
 0x230   : > { %v1325_v44 = vpop.f32.mrf.mxu0 }
 0x231   : > { %v1264_v45 = vsel %vm1181_vm1, %v1261_v43, -inf  ;;  %1461 = vmatpush.bf16.msra.mxu0 %v2480_v42  ;;  %v2486_v42 = vld [vmem:[#allocation20] sm:$0xff] }
 0x232   : > { %1265 = vmax.xlane.f32.xlu0 %v1264_v45 }
 0x236   : > { %v1262_v46 = vpop.f32.mrf.mxu3 }
 0x23e   : > { %v1386_v47 = vpop.f32.mrf.mxu3 }
 0x23f   : > { %v1387_v48 = vadd.f32 %v1386_v47, %v1175_v34  ;;  %v2697_v47 = vld [vmem:[#allocation12] ss:$0 sm:$0xff] }
 0x241   : > { %v1390_v49 = vsel %vm1181_vm1, %v1387_v48, -inf }
 0x242   : > { %1391 = vmax.xlane.f32.xlu2 %v1390_v49 }
 0x245   : > { %1337 = vrot.lane.b32.xlu1 %v3728_v11, %s3325_s17  ;;  %s1125_s17 = scalar_lea.vmem %s4009_s9, %s3717_s1  ;;  %s2081_s9 = scalar_lea.hbm %s4017_s15, %s2475_s23 }
 0x246   : > { %1400 = vrot.lane.b32.xlu0 %v3728_v11, %s3326_s29  ;;  %v1388_v50 = vpop.f32.mrf.mxu3  ;;  %v1129_v41 = vld [vmem:[%s1125_s17] sm:$0xff]  ;;  %s4018_s1 = sld [smem:[#allocation60_spill]]  ;;  %s2071_s29 = scalar_lea.sflag [#allocation5], %s3670_s14 }
 0x297   : > { %v1203_v51 = vpop.xlane.xlu1 %1202 }
 0x298   : > { %v1204_v52 = vsub.f32 %v1198_v36, %v1203_v51 }
 0x29a   : > { %v1205_v53 = vmul.f32 1.442695, %v1204_v52 }
 0x29c   : > { %2710 = vpow2.f32 %v1205_v53  ;;  %v3330_v53 = vmov 32.0  }
 0x29f   : > { %v1329_v56 = vpop.xlane.xlu1 %1328 }
 0x2a0   : > { %v1330_v59 = vsub.f32 %v1324_v40, %v1329_v56 }
 0x2a2   : > { %v2711_v54 = vpop.eup %2710  ;;  %v1331_v61 = vmul.f32 1.442695, %v1330_v59 }
 0x2a3   : > { %v1210_v55 = vpack.c.bf16 %v2711_v54, %v2711_v54  ;;  %v1207_v14 = vsel %vm1181_vm1, %v2711_v54, 0.0  ;;  %v2485_v54 = vld [vmem:[#allocation17 + $0x8] sm:$0xff] }
 0x2a4   : > { %1574 = vmatpush.bf16.msra.mxu3 %v2485_v54 }
 0x2a5   : > { %v1266_v57 = vpop.xlane.xlu0 %1265  ;;  %2388 = vmatmul.msk.bf16.vlgmr.msra.gmra.mxu2 %vm1181_vm1, %v1210_v55 }
 0x2a6   : > { %v1267_v58 = vsub.f32 %v1261_v43, %v1266_v57 }
 0x2a8   : > { %v1268_v60 = vmul.f32 1.442695, %v1267_v58 }
 0x2aa   : > { %2712 = vpow2.f32 %v1268_v60 }
 0x2ab   : > { %2714 = vpow2.f32 %v1331_v61 }
 0x2b0   : > { %v2713_v62 = vpop.eup %2712 }
 0x2b1   : > { %v1270_v63 = vsel %vm1181_vm1, %v2713_v62, 0.0  ;;  %v1273_v0 = vpack.c.bf16 %v2713_v62, %v2713_v62  ;;  %v2715_v3 = vpop.eup %2714 }
 0x2b2   : > { %1271 = vadd.xlane.f32.xlu2 %v1270_v63  ;;  %v1333_v10 = vsel %vm1181_vm1, %v2715_v3, 0.0  ;;  %v1336_v11 = vpack.c.bf16 %v2715_v3, %v2715_v3  ;;  %v2484_v3 = vld [vmem:[#allocation17] sm:$0xff] }
 0x2b3   : > { %1575 = vmatpush.bf16.msra.mxu3 %v2484_v3 }
 0x2b5   : > { %v1392_v1 = vpop.xlane.xlu2 %1391  ;;  %2390 = vmatmul.msk.bf16.vlgmr.msrb.gmra.mxu2 %vm1181_vm1, %v1273_v0 }
 0x2b6   : > { %v1393_v4 = vsub.f32 %v1387_v48, %v1392_v1  ;;  %v1128_v1 = vld [vmem:[%s1121_s24] sm:$0xff]  ;;  %s4012_s24 = sld [smem:[#allocation57_spill]] }
 0x2b7   : > { %v1338_v5 = vpop.permute.xlu1 %1337 }
 0x2b8   : > { %v1394_v6 = vmul.f32 1.442695, %v1393_v4  ;;  %v1401_v7 = vpop.permute.xlu0 %1400  ;;  %v1343_v8 = vsel %vm1216_vm2, %v1338_v5, 0  ;;  %v1544_v4 = vpack.c.bf16 %v1128_v1, %v1128_v1  ;;  %v2483_v5 = vld [vmem:[#allocation14 + $0x8] sm:$0xff] }
 0x2b9   : > { %v1406_v9 = vsel %vm1216_vm2, %v1401_v7, 0  ;;  %1352 = vmatpush.bf16.msrb.mxu1 %v1343_v8 }
 0x2ba   : > { %2716 = vpow2.f32 %v1394_v6  ;;  %1415 = vmatpush.bf16.msra.mxu2 %v1406_v9  ;;  %1334 = vadd.xlane.f32.xlu2 %v1333_v10  ;;  %v2482_v6 = vld [vmem:[#allocation14] sm:$0xff] }
 0x2bb   : > { %2421 = vmatmul.msk.bf16.vlgmr.msra.gmra.mxu3 %vm1151_vm0, %v1544_v4 }
 0x2bc   : > { %2392 = vmatmul.msk.bf16.vlgmr.msrb.gmra.mxu1 %vm1181_vm1, %v1336_v11 }
 0x2bd   : > { %1537 = vmatpush.bf16.msra.mxu1 %v2483_v5 }
 0x2c0   : > { %v2717_v12 = vpop.eup %2716 }
 0x2c1   : > { %v1396_v13 = vsel %vm1181_vm1, %v2717_v12, 0.0  ;;  %v1399_v15 = vpack.c.bf16 %v2717_v12, %v2717_v12  ;;  %1538 = vmatpush.bf16.msra.mxu1 %v2482_v6 }
 0x2c2   : > { %1397 = vadd.xlane.f32.xlu0 %v1396_v13  ;;  %1208 = vadd.xlane.f32.xlu2 %v1207_v14 }
 0x2c5   : > { %2394 = vmatmul.msk.bf16.vlgmr.msra.gmra.mxu2 %vm1181_vm1, %v1399_v15 }
 0x325   : > { %v1272_v16 = vpop.xlane.xlu2 %1271 }
 0x326   : > { %2718 = vrcp.f32 %v1272_v16  ;;  %v2698_v16 = vld [vmem:[#allocation26] ss:$0 sm:$0xff] }
 0x328   : > { %v1229_v17 = vpop.f32.mrf.mxu2 }
 0x32c   : > { %v2719_v21 = vpop.eup %2718 }
 0x32d   : > { %v1335_v18 = vpop.xlane.xlu2 %1334 }
 0x32e   : > { %2720 = vrcp.f32 %v1335_v18  ;;  %v2699_v18 = vld [vmem:[%s3942_s18] ss:$0 sm:$0xff] }
 0x330   : > { %v1231_v19 = vpop.f32.mrf.mxu2 }
 0x334   : > { %v2721_v23 = vpop.eup %2720 }
 0x335   : > { %v1209_v20 = vpop.xlane.xlu2 %1208  ;;  %v1398_v31 = vpop.xlane.xlu0 %1397 }
 0x336   : > { %2722 = vrcp.f32 %v1209_v20 }
 0x337   : > { %2724 = vrcp.f32 %v1398_v31  ;;  %v2487_v31 = vld [vmem:[#allocation20 + $0x8] sm:$0xff] }
 0x338   : > { %v1291_v22 = vpop.f32.mrf.mxu2  ;;  %2726 = vrcp.f32 %v3330_v53  ;;  %1611 = vmatpush.bf16.msrb.mxu2 %v2487_v31 }
 0x339   : > { %v1296_v24 = vmul.f32 %v2719_v21, %v1291_v22  ;;  %v1354_v25 = vpop.f32.mrf.mxu1 }
 0x33a   : > { %v1359_v26 = vmul.f32 %v2721_v23, %v1354_v25  ;;  %v2700_v23 = vld [vmem:[#allocation18] ss:$0 sm:$0xff] }
 0x33b   : > { %v1297_v27 = vpack.c.bf16 %v1296_v24, %v1296_v24 }
 0x33c   : > { %v1360_v28 = vpack.c.bf16 %v1359_v26, %v1359_v26  ;;  %v2723_v29 = vpop.eup %2722  ;;  %1612 = vmatpush.bf16.msrb.mxu2 %v2486_v42 }
 0x33d   : > { %1299 = vrot.lane.b32.xlu1 %v1297_v27, %s3327_s20  ;;  %v1234_v30 = vmul.f32 %v2723_v29, %v1229_v17  ;;  %v2725_v36 = vpop.eup %2724 }
 0x33e   : > { %1362 = vrot.lane.b32.xlu2 %v1360_v28, %s3328_s5  ;;  %v2727_v55 = vpop.eup %2726  ;;  %v1577_v24 = vpop.f32.mrf.mxu3 }
 0x33f   : > { %v1235_v32 = vpack.c.bf16 %v1234_v30, %v1234_v30  ;;  %v1474_v56 = vmul.f32 32.0, %v2727_v55  ;;  %vm1478_vm8 = vweird.f32 %v2727_v55  ;;  %v1578_v25 = vadd.f32 %v2700_v23, %v1577_v24 }
 0x340   : > { %v1293_v34 = vpop.f32.mrf.mxu2 }
 0x341   : > { %v1356_v35 = vpop.f32.mrf.mxu1  ;;  %1237 = vst.msk [vmem:[#allocation2] sm:$0xf] %vm1236_vm4, %v1235_v32  ;;  %v1475_v57 = vsub.f32 1.0, %v1474_v56  ;;  %v1620_v26 = vpack.c.bf16 %v1578_v25, %v1578_v25  ;;  %v2701_v32 = vld [vmem:[#allocation15] ss:$0 sm:$0xff] }
 0x343   : > { %v1476_v58 = vmul.f32 %v2727_v55, %v1475_v57  ;;  %v1631_v27 = vsel %vm1181_vm1, %v1620_v26, 0  ;;  %v1685_v28 = vunpack.c.l.b16 %v1620_v26 }
 0x344   : > { %1640 = vmatpush.bf16.xpose.msrb.mxu0 %v1631_v27 }
 0x345   : > { %v1477_v59 = vadd.f32 %v2727_v55, %v1476_v58  ;;  %v1686_v29 = vpack.c.b16 %v1685_v28, %v1685_v28 }
 0x346   : > { %v1579_v30 = vpop.f32.mrf.mxu3 }
 0x347   : > { %v3777_v60 = vsel %vm1478_vm8, %v2727_v55, %v1477_v59  ;;  %1687 = vrot.lane.b32.xlu0 %v1686_v29, %s3317_s19 }
 0x348   : > { %v1417_v37 = vpop.f32.mrf.mxu2 }
 0x349   : > { %v1422_v38 = vmul.f32 %v2725_v36, %v1417_v37 }
 0x34b   : > { %v1423_v39 = vpack.c.bf16 %v1422_v38, %v1422_v38 }
 0x34d   : > { %1425 = vrot.lane.b32.xlu1 %v1423_v39, %s3329_s0 }
 0x350   : > { %v1419_v40 = vpop.f32.mrf.mxu2 }
 0x398   : > { %v1363_v44 = vpop.permute.xlu2 %1362 }
 0x3af   : > { %v1300_v43 = vpop.permute.xlu1 %1299 }
 0x3b0   : > { %1303 = vst.msk [vmem:[#allocation2] sm:$0xf] %vm1302_vm5, %v1300_v43  ;;  %v1581_v43 = vpack.c.bf16 %v1129_v41, %v1129_v41 }
 0x3b1   : > { %1366 = vst.msk [vmem:[#allocation2] sm:$0xf] %vm1365_vm6, %v1363_v44 }
 0x3b2   : > { %2430 = vmatmul.msk.bf16.vlgmr.msrb.gmra.mxu2 %vm1151_vm0, %v1581_v43 }
 0x3bf   : > { %v1426_v45 = vpop.permute.xlu1 %1425 }
 0x3c0   : > { %1429 = vst.msk [vmem:[#allocation2] sm:$0xf] %vm1428_vm7, %v1426_v45 }
 0x3c7   : > { %v1430_v46 = vld [vmem:[#allocation2] sm:$0xf] }
 0x3c8   : > { %2403 = vmatmul.msk.bf16.vlgmr.msra.gmra.mxu0 %vm1151_vm0, %v1430_v46  ;;  %v1688_v46 = vpop.permute.xlu0 %1687 }
 0x445   : > { %v1463_v48 = vpop.f32.mrf.mxu0 }
 0x446   : > { %v1464_v49 = vadd.f32 %v2697_v47, %v1463_v48  ;;  %v1693_v48 = vsel %vm1181_vm1, %v1688_v46, 0 }
 0x447   : > { %1702 = vmatpush.bf16.xpose.msrb.mxu3 %v1693_v48 }
 0x448   : > { %v1467_v50 = vadd.f32 %v1464_v49, %v3723_v2 }
 0x44a   : > { %v1470_v51 = vsel %vm1151_vm0, %v1467_v50, 0.0 }
 0x44b   : > { %1471 = vadd.xlane.f32.xlu1 %v1470_v51 }
 0x44d   : > { %v1465_v52 = vpop.f32.mrf.mxu0 }
 0x464   : > { %1814 = vrot.lane.b32.xlu1 %v1686_v29, %s3316_s22 }
 0x4be   : > { %v1472_v61 = vpop.xlane.xlu1 %1471 }
 0x4bf   : > { %v1480_v2 = vmul.f32 %v3777_v60, %v1472_v61 }
 0x4c1   : > { %v1481_v62 = vsub.f32 %v1467_v50, %v1480_v2  ;;  %v1622_v50 = vld [vmem:[%s3674_s26] sm:$0x3] }
 0x4c2   : > { %v1623_v51 = vunpack.c.0.s8 %v1622_v50  ;;  %v2702_v2 = vld [vmem:[#allocation21] ss:$0 sm:$0xff] }
 0x4c3   : > { %v1482_v63 = vmul.f32 %v1481_v62, %v1481_v62 }
 0x4c4   : > { %v1624_v52 = vcvt.s32.f32 %v1623_v51 }
 0x4c5   : > { %v1483_v0 = vsel %vm1151_vm0, %v1482_v63, 0.0 }
 0x4c6   : > { %1484 = vadd.xlane.f32.xlu2 %v1483_v0  ;;  %vm1625_vm12 = vcmp.gt.f32.partialorder %v1624_v52, 0.0 }
 0x4c7   : > { %v1626_v54 = vsel %vm1625_vm12, 0.0, %v3324_v33 }
 0x4d6   : > { %v1815_v47 = vpop.permute.xlu1 %1814 }
 0x4d7   : > { %v1820_v49 = vsel %vm1181_vm1, %v1815_v47, 0 }
 0x4d8   : > { %1829 = vmatpush.bf16.xpose.msra.mxu3 %v1820_v49 }
 0x4de   : > { %1752 = vrot.lane.b32.xlu2 %v1686_v29, %s3321_s16 }
 0x539   : > { %v1485_v7 = vpop.xlane.xlu2 %1484 }
 0x53a   : > { %v1486_v8 = vmul.f32 %v1485_v7, %v3777_v60 }
 0x53c   : > { %v1487_v9 = vadd.f32 1e-12, %v1486_v8 }
 0x53e   : > { %2728 = vrsqrt.f32 %v1487_v9  ;;  %vm1494_vm10 = vweird.f32 %v1487_v9 }
 0x541   : > { %v1753_v44 = vpop.permute.xlu2 %1752 }
 0x542   : > { %v1758_v45 = vsel %vm1181_vm1, %v1753_v44, 0 }
 0x543   : > { %1767 = vmatpush.bf16.xpose.msra.mxu0 %v1758_v45 }
 0x544   : > { %v2729_v10 = vpop.eup %2728 }
 0x545   : > { %v1489_v11 = vmul.f32 %v2729_v10, %v1487_v9  ;;  %vm1495_vm9 = vweird.f32 %v2729_v10 }
 0x546   : > { %vm1496_vm11 = vmor %vm1494_vm10, %vm1495_vm9 }
 0x547   : > { %v1490_v12 = vmul.f32 %v2729_v10, %v1489_v11 }
 0x549   : > { %v1491_v13 = vmul.f32 0.5, %v1490_v12 }
 0x54b   : > { %v1492_v14 = vsub.f32 1.5, %v1491_v13 }
 0x54d   : > { %v1493_v15 = vmul.f32 %v2729_v10, %v1492_v14 }
 0x54f   : > { %v1497_v17 = vsel %vm1496_vm11, %v2729_v10, %v1493_v15 }
 0x550   : > { %v1498_v19 = vmul.f32 %v1497_v17, %v1481_v62  ;;  %v1614_v62 = vpop.f32.mrf.mxu2 }
 0x551   : > { %v1615_v63 = vadd.f32 %v2702_v2, %v1614_v62 }
 0x552   : > { %v1502_v20 = vmul.f32 %v2698_v16, %v1498_v19 }
 0x553   : > { %v1621_v0 = vpack.c.bf16 %v1615_v63, %v1615_v63 }
 0x554   : > { %v3790_v21 = vadd.f32 %v2699_v18, %v1502_v20 }
 0x555   : > { %v1660_v1 = vsel %vm1216_vm2, %v1621_v0, 0  ;;  %v1719_v3 = vunpack.c.l.b16 %v1621_v0 }
 0x556   : > { %v1507_v22 = vpack.c.bf16 %v3790_v21, %v3790_v21  ;;  %1669 = vmatpush.bf16.msrb.mxu1 %v1660_v1 }
 0x557   : > { %v1720_v33 = vpack.c.b16 %v1719_v3, %v1719_v3 }
 0x558   : > { %2412 = vmatmul.msk.bf16.vlgmr.msra.gmra.mxu1 %vm1151_vm0, %v1507_v22  ;;  %v1616_v4 = vpop.f32.mrf.mxu2 }
 0x559   : > { %1721 = vrot.lane.b32.xlu2 %v1720_v33, %s3317_s19 }
 0x5b3   : > { %v1722_v10 = vpop.permute.xlu2 %1721 }
 0x5b4   : > { %v1727_v12 = vsel %vm1216_vm2, %v1722_v10, 0 }
 0x5b5   : > { %1736 = vmatpush.bf16.msra.mxu2 %v1727_v12 }
 0x5d5   : > { %v1540_v34 = vpop.f32.mrf.mxu1 }
 0x5d6   : > { %v1541_v35 = vadd.f32 %v2701_v32, %v1540_v34 }
 0x5d8   : > { %v1618_v36 = vmul.f32 0.35355338, %v1541_v35 }
 0x5da   : > { %v1619_v37 = vpack.c.bf16 %v1618_v36, %v1618_v36 }
 0x5dc   : > { %v1680_v38 = vunpack.c.l.b16 %v1619_v37  ;;  %2431 = vmatmul.msk.bf16.vlgmr.msrb.gmra.mxu0 %vm1181_vm1, %v1619_v37 }
 0x5dd   : > { %v1542_v39 = vpop.f32.mrf.mxu1 }
 0x5de   : > { %v1681_v40 = vpack.c.b16 %v1680_v38, %v1680_v38 }
 0x5e0   : > { %1682 = vrot.lane.b32.xlu0 %v1681_v40, %s3317_s19  ;;  %s2083_s19 = sshll.u32 %s1113_s10, 4  ;;  %s2084_s19 = int_to_ptr.vmem [resolvable:$true] %s2083_s19 }
 0x5e8   : > { %1812 = vrot.lane.b32.xlu0 %v1681_v40, %s3316_s22 }
 0x5f0   : > { %1750 = vrot.lane.b32.xlu0 %v1681_v40, %s3321_s16 }
 0x652   : > { %v1683_v53 = vpop.permute.xlu0 %1682 }
 0x653   : > { %2433 = vmatmul.msk.bf16.vlgmr.msrb.gmra.mxu3 %vm1181_vm1, %v1683_v53 }
 0x659   : > { %v1642_v55 = vpop.f32.mrf.mxu0 }
 0x65a   : > { %v1643_v56 = vadd.f32 %v1642_v55, %v1626_v54  ;;  %v1813_v57 = vpop.permute.xlu0 %1812 }
 0x65c   : > { %v1646_v58 = vsel %vm1181_vm1, %v1643_v56, -inf }
 0x65d   : > { %1647 = vmax.xlane.f32.xlu1 %v1646_v58 }
 0x661   : > { %v1644_v59 = vpop.f32.mrf.mxu0 }
 0x662   : > { %v1751_v61 = vpop.permute.xlu0 %1750 }
 0x663   : > { %2435 = vmatmul.msk.bf16.vlgmr.msra.gmra.mxu0 %vm1181_vm1, %v1751_v61  ;;  %2437 = vmatmul.msk.bf16.vlgmr.msra.gmra.mxu3 %vm1181_vm1, %v1813_v57 }
 0x676   : > { %1845 = vrot.lane.b32.xlu1 %v1720_v33, %s3316_s22  ;;  %s4010_s22 = sld [smem:[#allocation61_spill]] }
 0x6d0   : > { %v1648_v5 = vpop.xlane.xlu1 %1647 }
 0x6d1   : > { %v1649_v6 = vsub.f32 %v1643_v56, %v1648_v5 }
 0x6d3   : > { %v1650_v7 = vmul.f32 1.442695, %v1649_v6 }
 0x6d5   : > { %2730 = vpow2.f32 %v1650_v7 }
 0x6d6   : > { %v1704_v8 = vpop.f32.mrf.mxu3 }
 0x6d7   : > { %v1705_v9 = vadd.f32 %v1704_v8, %v1626_v54 }
 0x6d9   : > { %v1708_v11 = vsel %vm1181_vm1, %v1705_v9, -inf }
 0x6da   : > { %1709 = vmax.xlane.f32.xlu0 %v1708_v11  ;;  %v2488_v11 = vld [vmem:[#allocation23] sm:$0xff] }
 0x6db   : > { %v2731_v13 = vpop.eup %2730 }
 0x6dc   : > { %v1655_v14 = vpack.c.bf16 %v2731_v13, %v2731_v13  ;;  %v1652_v41 = vsel %vm1181_vm1, %v2731_v13, 0.0 }
 0x6de   : > { %2432 = vmatmul.msk.bf16.vlgmr.msrb.gmra.mxu1 %vm1181_vm1, %v1655_v14  ;;  %v1706_v15 = vpop.f32.mrf.mxu3 }
 0x6df   : > { %v2703_v15 = vld [vmem:[#allocation24] ss:$0 sm:$0xff] }
 0x6e0   : > { %v1769_v16 = vpop.f32.mrf.mxu0 }
 0x6e1   : > { %v1770_v17 = vadd.f32 %v1769_v16, %v1626_v54 }
 0x6e3   : > { %v1773_v18 = vsel %vm1181_vm1, %v1770_v17, -inf }
 0x6e4   : > { %1774 = vmax.xlane.f32.xlu0 %v1773_v18 }
 0x6e6   : > { %v1831_v19 = vpop.f32.mrf.mxu3 }
 0x6e7   : > { %v1832_v20 = vadd.f32 %v1831_v19, %v1626_v54 }
 0x6e8   : > { %v1771_v22 = vpop.f32.mrf.mxu0  ;;  %v1846_v25 = vpop.permute.xlu1 %1845 }
 0x6e9   : > { %v1835_v23 = vsel %vm1181_vm1, %v1832_v20, -inf  ;;  %v1851_v26 = vsel %vm1216_vm2, %v1846_v25, 0 }
 0x6ea   : > { %1836 = vmax.xlane.f32.xlu2 %v1835_v23  ;;  %1860 = vmatpush.bf16.msrb.mxu2 %v1851_v26 }
 0x6ee   : > { %v1833_v24 = vpop.f32.mrf.mxu3 }
 0x6f8   : > { %1783 = vrot.lane.b32.xlu0 %v1720_v33, %s3321_s16  ;;  %s4014_s16 = sld [smem:[#allocation62_spill]] }
 0x74d   : > { %v1710_v27 = vpop.xlane.xlu0 %1709 }
 0x74e   : > { %v1711_v28 = vsub.f32 %v1705_v9, %v1710_v27  ;;  %v2489_v9 = vld [vmem:[#allocation23 + $0x8] sm:$0xff] }
 0x74f   : > { %1904 = vmatpush.bf16.msrb.mxu0 %v2489_v9  ;;  %v2491_v27 = vld [vmem:[%s4010_s22 + $0x8] sm:$0xff] }
 0x750   : > { %v1712_v29 = vmul.f32 1.442695, %v1711_v28 }
 0x752   : > { %2732 = vpow2.f32 %v1712_v29 }
 0x753   : > { %1905 = vmatpush.bf16.msrb.mxu0 %v2488_v11  ;;  %v2708_v11 = vld [vmem:[%s4016_s28] ss:$0 sm:$0xff] }
 0x757   : > { %v1775_v30 = vpop.xlane.xlu0 %1774 }
 0x758   : > { %v2733_v31 = vpop.eup %2732  ;;  %v1776_v32 = vsub.f32 %v1770_v17, %v1775_v30 }
 0x759   : > { %v1717_v34 = vpack.c.bf16 %v2733_v31, %v2733_v31  ;;  %v1714_v35 = vsel %vm1181_vm1, %v2733_v31, 0.0 }
 0x75a   : > { %v1777_v36 = vmul.f32 1.442695, %v1776_v32  ;;  %1715 = vadd.xlane.f32.xlu2 %v1714_v35 }
 0x75b   : > { %v1671_v37 = vpop.f32.mrf.mxu1  ;;  %2434 = vmatmul.msk.bf16.vlgmr.msra.gmra.mxu2 %vm1181_vm1, %v1717_v34 }
 0x75c   : > { %2734 = vpow2.f32 %v1777_v36 }
 0x75d   : > { %v1837_v38 = vpop.xlane.xlu2 %1836 }
 0x75e   : > { %v1838_v39 = vsub.f32 %v1832_v20, %v1837_v38 }
 0x760   : > { %v1839_v40 = vmul.f32 1.442695, %v1838_v39 }
 0x762   : > { %v2735_v42 = vpop.eup %2734  ;;  %2736 = vpow2.f32 %v1839_v40  ;;  %1653 = vadd.xlane.f32.xlu2 %v1652_v41  ;;  %v2704_v40 = vld [vmem:[%s4012_s24] ss:$0 sm:$0xff] }
 0x763   : > { %v1673_v43 = vpop.f32.mrf.mxu1  ;;  %v1779_v44 = vsel %vm1181_vm1, %v2735_v42, 0.0  ;;  %v1782_v50 = vpack.c.bf16 %v2735_v42, %v2735_v42  ;;  %v2705_v42 = vld [vmem:[%s4013_s12] ss:$0 sm:$0xff] }
 0x764   : > { %1780 = vadd.xlane.f32.xlu1 %v1779_v44 }
 0x768   : > { %v2737_v45 = vpop.eup %2736 }
 0x769   : > { %v1844_v46 = vpack.c.bf16 %v2737_v45, %v2737_v45  ;;  %v1841_v47 = vsel %vm1181_vm1, %v2737_v45, 0.0 }
 0x76a   : > { %v1784_v48 = vpop.permute.xlu0 %1783  ;;  %1842 = vadd.xlane.f32.xlu0 %v1841_v47 }
 0x76b   : > { %v1789_v49 = vsel %vm1216_vm2, %v1784_v48, 0  ;;  %2438 = vmatmul.msk.bf16.vlgmr.msrb.gmra.mxu2 %vm1181_vm1, %v1844_v46 }
 0x76c   : > { %1798 = vmatpush.bf16.msra.mxu1 %v1789_v49  ;;  %v2706_v49 = vld [vmem:[%s4014_s16] ss:$0 sm:$0xff]  ;;  %s2085_s16 = sshll.u32 %s2081_s9, 4  ;;  %s2086_s16 = int_to_ptr.hbm [resolvable:$true] %s2085_s16 }
 0x76f   : > { %2436 = vmatmul.msk.bf16.vlgmr.msra.gmra.mxu1 %vm1181_vm1, %v1782_v50  ;;  %vm2019_vm1 = vcmask 523264  }
 0x770   : > { %1974 = vmatpush.bf16.msrb.mxu1 %v2491_v27 }
 0x7cd   : > { %v1716_v51 = vpop.xlane.xlu2 %1715 }
 0x7d5   : > { %v1654_v52 = vpop.xlane.xlu2 %1653 }
 0x7d6   : > { %2738 = vrcp.f32 %v1654_v52 }
 0x7d7   : > { %2740 = vrcp.f32 %v1716_v51  ;;  %v1781_v61 = vpop.xlane.xlu1 %1780 }
 0x7d8   : > { %2742 = vrcp.f32 %v1781_v61 }
 0x7dc   : > { %v2739_v53 = vpop.eup %2738 }
 0x7dd   : > { %v1676_v54 = vmul.f32 %v2739_v53, %v1671_v37  ;;  %v2741_v55 = vpop.eup %2740  ;;  %v1843_v2 = vpop.xlane.xlu0 %1842 }
 0x7de   : > { %v1738_v56 = vpop.f32.mrf.mxu2  ;;  %2744 = vrcp.f32 %v1843_v2  ;;  %v2743_v63 = vpop.eup %2742 }
 0x7df   : > { %v1677_v57 = vpack.c.bf16 %v1676_v54, %v1676_v54  ;;  %v1743_v58 = vmul.f32 %v2741_v55, %v1738_v56 }
 0x7e1   : > { %1678 = vst.msk [vmem:[#allocation2] sm:$0xf] %vm1236_vm4, %v1677_v57  ;;  %v1744_v59 = vpack.c.bf16 %v1743_v58, %v1743_v58 }
 0x7e3   : > { %1746 = vrot.lane.b32.xlu2 %v1744_v59, %s3327_s20  ;;  %s3214_s20 = sshra.s32 %s2086_s16, 4  ;;  %s3215_s20 = int_to_ptr.hbm [resolvable:$true] %s3214_s20 }
 0x7e4   : > { %v2745_v3 = vpop.eup %2744  ;;  %p3221_p9 = scmp.lt.s32.totalorder %s3215_s20, %s4017_s15 }
 0x7e6   : > { %v1740_v62 = vpop.f32.mrf.mxu2 }
 0x7ec   : > { %v1800_v0 = vpop.f32.mrf.mxu1 }
 0x7ed   : > { %v1805_v1 = vmul.f32 %v2743_v63, %v1800_v0 }
 0x7ee   : > { %v1862_v33 = vpop.f32.mrf.mxu2 }
 0x7ef   : > { %v1806_v4 = vpack.c.bf16 %v1805_v1, %v1805_v1  ;;  %v1867_v5 = vmul.f32 %v2745_v3, %v1862_v33 }
 0x7f1   : > { %v1868_v6 = vpack.c.bf16 %v1867_v5, %v1867_v5  ;;  %1808 = vrot.lane.b32.xlu2 %v1806_v4, %s3328_s5  ;;  %s4011_s5 = sld [smem:[#allocation63_spill]] }
 0x7f3   : > { %1870 = vrot.lane.b32.xlu1 %v1868_v6, %s3329_s0  ;;  %s4015_s0 = sld [smem:[#allocation64_spill]] }
 0x7f4   : > { %v1802_v7 = vpop.f32.mrf.mxu1 }
 0x7f6   : > { %v1864_v8 = vpop.f32.mrf.mxu2 }
 0x7f7   : > { %v2495_v28 = vld [vmem:[%s4011_s5 + $0x18] sm:$0xff]  ;;  %v2494_v31 = vld [vmem:[%s4011_s5 + $0x10] sm:$0xff]  ;;  %v2493_v47 = vld [vmem:[%s4011_s5 + $0x8] sm:$0xff] }
 0x7f8   : > { %2027 = vmatpush.bf16.msrb.mxu3 %v2495_v28  ;;  %v2492_v48 = vld [vmem:[%s4011_s5] sm:$0xff] }
 0x7f9   : > { %v2707_v55 = vld [vmem:[%s4015_s0] ss:$0 sm:$0xff]  ;;  %s3216_s0 = scalar_lea.hbm %s3215_s20, 8 }
 0x7fa   : > { %p3217_p1 = scmp.ne.s32.totalorder %s3215_s20, %s3216_s0  ;;  %p3222_p8 = scmp.lt.s32.totalorder %s3220_s11, %s3216_s0 }
 0x7fc   : > { %2028 = vmatpush.bf16.msrb.mxu3 %v2494_v31  ;;  %p3218_p13 = pnand %p3217_p1, %p3619_p0  ;;  %p3223_p10 = por %p3222_p8, %p3221_p9 }
 0x7fe   : > { %p3219_p7 = pneg %p3218_p13 }
 0x800   : > { %2029 = vmatpush.bf16.msrb.mxu3 %v2493_v47  ;;  %p3224_p12 = pnand %p3223_p10, %p3219_p7 }
 0x804   : > { %2030 = vmatpush.bf16.msrb.mxu3 %v2492_v48 }
 0x83d   : > { %v1747_v10 = vpop.permute.xlu2 %1746 }
 0x83e   : > { %1749 = vst.msk [vmem:[#allocation2] sm:$0xf] %vm1302_vm5, %v1747_v10 }
 0x84b   : > { %v1809_v12 = vpop.permute.xlu2 %1808 }
 0x84c   : > { %1811 = vst.msk [vmem:[#allocation2] sm:$0xf] %vm1365_vm6, %v1809_v12 }
 0x865   : > { %v1871_v13 = vpop.permute.xlu1 %1870 }
 0x866   : > { %1873 = vst.msk [vmem:[#allocation2] sm:$0xf] %vm1428_vm7, %v1871_v13  ;;  %v2709_v13 = vld [vmem:[%s4018_s1] ss:$0 sm:$0xff] }
 0x86d   : > { %v1874_v14 = vld [vmem:[#allocation2] sm:$0xf] }
 0x86e   : > { %2447 = vmatmul.msk.bf16.vlgmr.msrb.gmra.mxu0 %vm1151_vm0, %v1874_v14 }
 0x8eb   : > { %v1907_v16 = vpop.f32.mrf.mxu0 }
 0x8ec   : > { %v1908_v17 = vadd.f32 %v2703_v15, %v1907_v16 }
 0x8ee   : > { %v1911_v18 = vadd.f32 %v1908_v17, %v3790_v21  ;;  %v2490_v21 = vld [vmem:[%s4010_s22] sm:$0xff] }
 0x8ef   : > { %1975 = vmatpush.bf16.msrb.mxu1 %v2490_v21 }
 0x8f0   : > { %v1914_v19 = vsel %vm1151_vm0, %v1911_v18, 0.0 }
 0x8f1   : > { %1915 = vadd.xlane.f32.xlu2 %v1914_v19 }
 0x8f3   : > { %v1909_v20 = vpop.f32.mrf.mxu0 }
 0x964   : > { %v1916_v22 = vpop.xlane.xlu2 %1915 }
 0x965   : > { %v1917_v23 = vmul.f32 %v1916_v22, %v3777_v60 }
 0x967   : > { %v1918_v24 = vsub.f32 %v1911_v18, %v1917_v23 }
 0x969   : > { %v1919_v25 = vmul.f32 %v1918_v24, %v1918_v24 }
 0x96b   : > { %v1920_v26 = vsel %vm1151_vm0, %v1919_v25, 0.0 }
 0x96c   : > { %1921 = vadd.xlane.f32.xlu0 %v1920_v26 }
 0x9df   : > { %v1922_v29 = vpop.xlane.xlu0 %1921 }
 0x9e0   : > { %v1923_v30 = vmul.f32 %v1922_v29, %v3777_v60 }
 0x9e2   : > { %v1924_v32 = vadd.f32 1e-12, %v1923_v30 }
 0x9e4   : > { %2746 = vrsqrt.f32 %v1924_v32  ;;  %vm1931_vm14 = vweird.f32 %v1924_v32 }
 0x9ea   : > { %v2747_v34 = vpop.eup %2746 }
 0x9eb   : > { %v1926_v35 = vmul.f32 %v2747_v34, %v1924_v32  ;;  %vm1932_vm13 = vweird.f32 %v2747_v34 }
 0x9ec   : > { %vm1933_vm15 = vmor %vm1931_vm14, %vm1932_vm13 }
 0x9ed   : > { %v1927_v36 = vmul.f32 %v2747_v34, %v1926_v35 }
 0x9ef   : > { %v1928_v37 = vmul.f32 0.5, %v1927_v36 }
 0x9f1   : > { %v1929_v38 = vsub.f32 1.5, %v1928_v37 }
 0x9f3   : > { %v1930_v39 = vmul.f32 %v2747_v34, %v1929_v38 }
 0x9f5   : > { %v1934_v41 = vsel %vm1933_vm15, %v2747_v34, %v1930_v39 }
 0x9f6   : > { %v1935_v43 = vmul.f32 %v1934_v41, %v1918_v24 }
 0x9f8   : > { %v1939_v44 = vmul.f32 %v2704_v40, %v1935_v43 }
 0x9fa   : > { %v1943_v45 = vadd.f32 %v2705_v42, %v1939_v44 }
 0x9fc   : > { %v1944_v46 = vpack.c.bf16 %v1943_v45, %v1943_v45 }
 0x9fe   : > { %2456 = vmatmul.msk.bf16.vlgmr.msrb.gmra.mxu1 %vm1151_vm0, %v1944_v46 }
 0xa7b   : > { %v1977_v50 = vpop.f32.mrf.mxu1 }
 0xa7c   : > { %v1978_v51 = vadd.f32 %v2706_v49, %v1977_v50 }
 0xa7e   : > { %v1981_v52 = vmax.f32 %v1978_v51, 0.0 }
 0xa80   : > { %v1982_v53 = vpack.c.bf16 %v1981_v52, %v1981_v52 }
 0xa82   : > { %2473 = vmatmul.msk.bf16.vlgmr.msrb.gmra.mxu3 %vm2019_vm1, %v1982_v53 }
 0xa83   : > { %v1979_v54 = vpop.f32.mrf.mxu1 }
 0xb05   : > { %v2032_v56 = vpop.f32.mrf.mxu3 }
 0xb06   : > { %v2033_v57 = vadd.f32 %v2707_v55, %v2032_v56 }
 0xb08   : > { %v2036_v58 = vadd.f32 %v2033_v57, %v1943_v45 }
 0xb0a   : > { %v2039_v59 = vsel %vm1151_vm0, %v2036_v58, 0.0 }
 0xb0b   : > { %2040 = vadd.xlane.f32.xlu0 %v2039_v59 }
 0xb0d   : > { %v2034_v61 = vpop.f32.mrf.mxu3 }
 0xb7e   : > { %v2041_v2 = vpop.xlane.xlu0 %2040 }
 0xb7f   : > { %v2042_v62 = vmul.f32 %v2041_v2, %v3777_v60 }
 0xb81   : > { %v2043_v63 = vsub.f32 %v2036_v58, %v2042_v62 }
 0xb83   : > { %v2044_v0 = vmul.f32 %v2043_v63, %v2043_v63 }
 0xb85   : > { %v2045_v1 = vsel %vm1151_vm0, %v2044_v0, 0.0 }
 0xb86   : > { %2046 = vadd.xlane.f32.xlu0 %v2045_v1 }
 0xbf9   : > { %v2047_v3 = vpop.xlane.xlu0 %2046 }
 0xbfa   : > { %v2048_v33 = vmul.f32 %v2047_v3, %v3777_v60 }
 0xbfc   : > { %v2049_v4 = vadd.f32 1e-12, %v2048_v33 }
 0xbfe   : > { %2748 = vrsqrt.f32 %v2049_v4  ;;  %vm2056_vm3 = vweird.f32 %v2049_v4 }
 0xc04   : > { %v2749_v5 = vpop.eup %2748 }
 0xc05   : > { %v2051_v6 = vmul.f32 %v2749_v5, %v2049_v4  ;;  %vm2057_vm2 = vweird.f32 %v2749_v5 }
 0xc06   : > { %vm2058_vm4 = vmor %vm2056_vm3, %vm2057_vm2 }
 0xc07   : > { %v2052_v7 = vmul.f32 %v2749_v5, %v2051_v6 }
 0xc09   : > { %v2053_v8 = vmul.f32 0.5, %v2052_v7 }
 0xc0b   : > { %v2054_v9 = vsub.f32 1.5, %v2053_v8 }
 0xc0d   : > { %v2055_v10 = vmul.f32 %v2749_v5, %v2054_v9 }
 0xc0f   : > { %v2059_v60 = vsel %vm2058_vm4, %v2749_v5, %v2055_v10 }
 0xc10   : > { %v2060_v12 = vmul.f32 %v2059_v60, %v2043_v63 }
 0xc12   : > { %v2064_v14 = vmul.f32 %v2708_v11, %v2060_v12 }
 0xc14   : > { %v2068_v15 = vadd.f32 %v2709_v13, %v2064_v14 }
 0xc16   : > { %2069 = vst.msk [vmem:[%s1113_s10] sm:$0xff] %vm1151_vm0, %v2068_v15 }
 0xc17   : > { %3227 = shalt.err (!%p3224_p12)
}
 0xc18   : > { %2552 = dma.vmem_to_hbm [thread:$0]  (%p3619_p0), %s2084_s19, 128, %s2086_s16, %s2071_s29  }
 0xc19 PF: > { %s2097_s14 = sand.u32 1, %s3286_s7   ;;  %p4019_p5 = scmp.ge.s32.totalorder %s3298_s30, 2 }
 0xc1a   : > { %s2098_s6 = scalar_lea.sflag [#allocation5], %s2097_s14 }
 0xc1b   : > { %p2602_p11 = pnand %p4019_p5, %p3625_p6 }
 0xc1d   : > { %p2603_p2 = pneg %p2602_p11 }
 0xc1f   : > { %3281 = dma.done.wait (%p2603_p2), %s2098_s6, 128  }
 0xc20   : > { %3283 = vsyncadd (%p2603_p2), %s2098_s6, 4294967168  ;;  %s4020_s12 = sld [smem:[#allocation38_spill]]  ;;  %p49_p4 = scmp.ge.s32.totalorder %s3595_s2, 4  }
 0xc21   : > { %s4021_s7 = smov %s3290_s4  ;;  %s4022_s4 = smov %s3294_s8 }
 0xc22   : > { %s4024_s30 = smov %s3595_s2  ;;  %51 = sbr.rel (!%p49_p4) target bundleno = 41 (0x29), region = 247 }
 0xc26   : > { %s4023_s8 = smov %s4020_s12 }
 0xc27   :  { %2104 = vsyncpa [#allocation4], 1 }
 0xc28   :  { %2106 = vsyncpa [#allocation4 + $0x1], 1 }
 0xc29   :  { %2107 = vsyncpa [#allocation7], 1 }
 0xc2a   :  { %2109 = vsyncpa [#allocation7 + $0x1], 1 }
 0xc2b   :  { %2110 = vsyncpa [#allocation10], 1 }
 0xc2c   :  { %2111 = vsyncpa [#allocation13], 1 }
 0xc2d   :  { %2112 = vsyncpa [#allocation16], 1 }
 0xc2e   :  { %2113 = vsyncpa [#allocation19], 1 }
 0xc2f   :  { %2114 = vsyncpa [#allocation22], 1 }
 0xc30   :  { %2115 = vsyncpa [#allocation25], 1 }
 0xc31   :  { %2116 = vsyncpa [#allocation5], 1 }
 0xc32   :  { %2118 = vsyncpa [#allocation5 + $0x1], 1 }

</bundles_post_ra>
